<compile_context>
chip_gen: v7x
topology: tpu7x:2x2x1
jax: 0.10.0
libtpu: 0.0.40
codegen_flags: <defaults>
</compile_context>

<pallas_src>
import functools

import jax
import jax.numpy as jnp
from jax import lax
from jax.experimental import pallas as pl
from jax.experimental.pallas import tpu as pltpu


def scpb_kernel(x_ref, dmat_ref,
                dw1_w_ref, pw1_w_ref, pw1_b_ref,
                dw2_w_ref, pw2_w_ref, pw2_b_ref,
                c1_w_ref, c1_b_ref,
                o_ref, *, H, W):
    """Block shapes:
      x_ref    (1, Cin, S)      S = H*W, spatial flattened onto lanes
      dmat_ref (S, So)          0/1 stride-2 selection matrix, So = (H//2)*(W//2)
      dw*_w    (C, 9)           depthwise taps, k = 3*(dh+1) + (dw+1)
      pw*_w    (Co, Cin)        pointwise weights with BN scale folded in
      pw*_b    (Co, 1)          pointwise bias with dw-bias and BN shift folded
      c1_w     (Co, Cin), c1_b (Co, 1)
      o_ref    (1, Co, So)
    """
    S = H * W
    x = x_ref[0]                                             # (Cin, S) f32

    # Column index of every flattened position (for w-boundary masking).
    col = lax.broadcasted_iota(jnp.int32, (1, S), 1) % W
    not_last_col = col < (W - 1)
    not_first_col = col > 0

    pad = W + 1                                              # max |dh*W + dw|
    taps9 = [(dh, dw) for dh in (-1, 0, 1) for dw in (-1, 0, 1)]

    def padded(v):
        # Zero-pad the flattened spatial axis once; taps are static slices.
        c = v.shape[0]
        z = jnp.zeros((c, pad), v.dtype)
        return jnp.concatenate([z, v, z], axis=1)            # (C, S + 2*pad)

    def tap(vp, dh, dw):
        # shifted[c, h*W + w] = v[c, (h+dh)*W + (w+dw)], zero where OOB.
        d = dh * W + dw
        out = vp[:, pad + d: pad + d + S]
        # Only the w-boundary needs masking; the zero pad covers the h-boundary.
        if dw == 1:
            out = jnp.where(not_last_col, out, 0.0)
        elif dw == -1:
            out = jnp.where(not_first_col, out, 0.0)
        return out

    def depthwise3x3(v, w_ref):
        w = w_ref[...]                                       # (C, 9)
        vp = padded(v)
        acc = None
        for k, (dh, dw) in enumerate(taps9):
            t = tap(vp, dh, dw) * w[:, k:k + 1]
            acc = t if acc is None else acc + t              # init from 1st tap
        return acc                                           # (C, S)

    # ---------------- SCB 1: dw3x3 -> pw1x1 (bias/BN folded) -> ReLU --------
    y = jnp.dot(pw1_w_ref[...], depthwise3x3(x, dw1_w_ref),
                preferred_element_type=jnp.float32) + pw1_b_ref[...]
    y = jnp.maximum(y, 0.0)                                  # (Co, S)

    # ---------------- SCB 2 --------------------------------------------------
    z = jnp.dot(pw2_w_ref[...], depthwise3x3(y, dw2_w_ref),
                preferred_element_type=jnp.float32) + pw2_b_ref[...]
    z = jnp.maximum(z, 0.0)                                  # (Co, S)

    # -------- MaxPool2d(kernel=3, padding=1, stride=2) ----------------------
    # z >= 0 after ReLU, so zero-filled boundary taps are equivalent to the
    # implicit -inf padding of nn.MaxPool2d.
    zp = padded(z)
    m = None
    for (dh, dw) in taps9:
        t = tap(zp, dh, dw)
        m = t if m is None else jnp.maximum(m, t)            # (Co, S)

    # Stride-2 subsample via 0/1 selection matmul (MXU), shared with shortcut.
    dmat = dmat_ref[...]                                     # (S, So)
    m = jnp.dot(m, dmat, preferred_element_type=jnp.float32)     # (Co, So)

    # -------- shortcut: Conv2d 1x1, stride 2 on the original input ----------
    xs = jnp.dot(x, dmat, preferred_element_type=jnp.float32)    # (Cin, So)
    s = jnp.dot(c1_w_ref[...], xs,
                preferred_element_type=jnp.float32) + c1_b_ref[...]

    o_ref[0] = (s + m).astype(o_ref.dtype)


# --------------------------- wrapper-side folding ----------------------------
def _fold_params(p):
    """Fold depthwise bias + eval-mode BN into the pointwise weights/bias and
    re-layout everything for the (C, H*W) kernel layout."""

    def dw_taps(w):                          # (3, 3, C) -> (C, 9)
        return jnp.transpose(w.reshape(9, -1), (1, 0)).astype(jnp.float32)

    def fold_pw(pw_w, pw_b, dw_b, bn_s, bn_t):
        # y = bn_s * (pw_w^T @ (dw_out + dw_b) + pw_b) + bn_t
        w_eff = (bn_s[:, None] * pw_w.T).astype(jnp.float32)         # (Co, Ci)
        b_eff = (bn_s * (pw_b + dw_b @ pw_w) + bn_t).astype(jnp.float32)
        return w_eff, b_eff[:, None]                                  # (Co, 1)

    w1, b1 = fold_pw(p["pw1_w"], p["pw1_b"], p["dw1_b"], p["bn1_s"], p["bn1_t"])
    w2, b2 = fold_pw(p["pw2_w"], p["pw2_b"], p["dw2_b"], p["bn2_s"], p["bn2_t"])
    return dict(
        dw1=dw_taps(p["dw1_w"]), pw1_w=w1, pw1_b=b1,
        dw2=dw_taps(p["dw2_w"]), pw2_w=w2, pw2_b=b2,
        c1_w=jnp.transpose(p["c1_w"]).astype(jnp.float32),            # (Co, Ci)
        c1_b=p["c1_b"].astype(jnp.float32)[:, None],                  # (Co, 1)
    )


def _downsample_matrix(H, W):
    """(H*W, Ho*Wo) 0/1 matrix selecting the even-row/even-col positions."""
    Ho, Wo = H // 2, W // 2
    s = jnp.arange(H * W)
    t = jnp.arange(Ho * Wo)
    keep = ((s[:, None] // W == 2 * (t[None, :] // Wo)) &
            (s[:, None] % W == 2 * (t[None, :] % Wo)))
    return keep.astype(jnp.float32)


def scpb_forward(x_nchw, p):
    """x_nchw: (B, Cin, H, W) float32; returns (B, Cout, H//2, W//2)."""
    B, Cin, H, W = x_nchw.shape
    Co = p["pw1_w"].shape[1]
    assert H % 2 == 0 and W % 2 == 0
    Ho, Wo = H // 2, W // 2
    S, So = H * W, Ho * Wo

    f = _fold_params(p)
    x = x_nchw.reshape(B, Cin, S).astype(jnp.float32)   # free reshape (no transpose)
    dmat = _downsample_matrix(H, W)

    const2 = lambda shape: pl.BlockSpec(shape, lambda b: (0, 0))

    in_specs = [
        pl.BlockSpec((1, Cin, S), lambda b: (b, 0, 0)),   # x
        const2((S, So)),                                  # downsample matrix
        const2((Cin, 9)), const2((Co, Cin)), const2((Co, 1)),   # SCB1
        const2((Co, 9)), const2((Co, Co)), const2((Co, 1)),     # SCB2
        const2((Co, Cin)), const2((Co, 1)),                     # shortcut conv
    ]

    out = pl.pallas_call(
        functools.partial(scpb_kernel, H=H, W=W),
        out_shape=jax.ShapeDtypeStruct((B, Co, So), jnp.float32),
        grid_spec=pltpu.PrefetchScalarGridSpec(
            num_scalar_prefetch=0,
            grid=(B,),
            in_specs=in_specs,
            out_specs=pl.BlockSpec((1, Co, So), lambda b: (b, 0, 0)),
        ),
        compiler_params=pltpu.CompilerParams(
            dimension_semantics=("parallel",)),
    )(x, dmat,
      f["dw1"], f["pw1_w"], f["pw1_b"],
      f["dw2"], f["pw2_w"], f["pw2_b"],
      f["c1_w"], f["c1_b"])

    return out.reshape(B, Co, Ho, Wo)


# ----------------------- deterministic parameter init -----------------------
def init_params(key, cin, cout, eps=1e-5):
    ks = jax.random.split(key, 10)
    p = {
        "dw1_w": 0.2 * jax.random.normal(ks[0], (3, 3, cin), jnp.float32),
        "dw1_b": 0.1 * jax.random.normal(ks[1], (cin,), jnp.float32),
        "pw1_w": 0.2 * jax.random.normal(ks[2], (cin, cout), jnp.float32),
        "pw1_b": 0.1 * jax.random.normal(ks[3], (cout,), jnp.float32),
        "dw2_w": 0.2 * jax.random.normal(ks[4], (3, 3, cout), jnp.float32),
        "dw2_b": 0.1 * jax.random.normal(ks[5], (cout,), jnp.float32),
        "pw2_w": 0.2 * jax.random.normal(ks[6], (cout, cout), jnp.float32),
        "pw2_b": 0.1 * jax.random.normal(ks[7], (cout,), jnp.float32),
        "c1_w": 0.2 * jax.random.normal(ks[8], (cin, cout), jnp.float32),
        "c1_b": 0.1 * jax.random.normal(ks[9], (cout,), jnp.float32),
    }
    # BatchNorm2d with PyTorch-default params / running stats (eval mode).
    gamma = jnp.ones((cout,), jnp.float32)
    beta = jnp.zeros((cout,), jnp.float32)
    rmean = jnp.zeros((cout,), jnp.float32)
    rvar = jnp.ones((cout,), jnp.float32)
    scale = gamma / jnp.sqrt(rvar + eps)
    shift = beta - rmean * scale
    for i in (1, 2):
        p[f"bn{i}_s"] = scale
        p[f"bn{i}_t"] = shift
    return p


# --------------------------- pure-JAX reference ------------------------------
def scpb_reference(x_nchw, p):
    x = jnp.transpose(x_nchw, (0, 2, 3, 1)).astype(jnp.float32)   # NHWC
    cin = x.shape[-1]
    cout = p["pw1_w"].shape[1]
    dn = ("NHWC", "HWIO", "NHWC")

    def scb(v, dw_w, dw_b, pw_w, pw_b, bn_s, bn_t):
        c = v.shape[-1]
        v = lax.conv_general_dilated(v, dw_w.reshape(3, 3, 1, c), (1, 1),
                                     [(1, 1), (1, 1)], dimension_numbers=dn,
                                     feature_group_count=c) + dw_b
        v = lax.conv_general_dilated(v, pw_w.reshape(1, 1, c, -1), (1, 1),
                                     [(0, 0), (0, 0)], dimension_numbers=dn) + pw_b
        v = v * bn_s + bn_t
        return jnp.maximum(v, 0.0)

    y = scb(x, p["dw1_w"], p["dw1_b"], p["pw1_w"], p["pw1_b"], p["bn1_s"], p["bn1_t"])
    y = scb(y, p["dw2_w"], p["dw2_b"], p["pw2_w"], p["pw2_b"], p["bn2_s"], p["bn2_t"])
    y = lax.reduce_window(y, -jnp.inf, lax.max, (1, 3, 3, 1), (1, 2, 2, 1),
                          [(0, 0), (1, 1), (1, 1), (0, 0)])
    s = lax.conv_general_dilated(x, p["c1_w"].reshape(1, 1, cin, cout), (2, 2),
                                 [(0, 0), (0, 0)], dimension_numbers=dn) + p["c1_b"]
    return jnp.transpose(s + y, (0, 3, 1, 2))


if __name__ == "__main__":
    B, Cin, H, W = 2, 4, 16, 16
    Cout = 8

    key = jax.random.PRNGKey(0)
    kx, kp = jax.random.split(key)
    x = jax.random.normal(kx, (B, Cin, H, W), jnp.float32)
    params = init_params(kp, Cin, Cout)

    out = jax.block_until_ready(scpb_forward(x, params))

    assert out.shape == (B, Cout, H // 2, W // 2), out.shape
    ref = scpb_reference(x, params)
    err = float(jnp.max(jnp.abs(out - ref)))
    assert err < 1e-4, f"max abs err {err}"

    print("KERNEL_OK")
</pallas_src>

<mosaic_0001>
module attributes {stable_mosaic.version = 11 : i64} {
  func.func @scpb_kernel(%arg0: i32, %arg1: memref<1x4x256xf32, #tpu.memory_space<vmem>>, %arg2: memref<256x64xf32, #tpu.memory_space<vmem>>, %arg3: memref<4x9xf32, #tpu.memory_space<vmem>>, %arg4: memref<8x4xf32, #tpu.memory_space<vmem>>, %arg5: memref<8x1xf32, #tpu.memory_space<vmem>>, %arg6: memref<8x9xf32, #tpu.memory_space<vmem>>, %arg7: memref<8x8xf32, #tpu.memory_space<vmem>>, %arg8: memref<8x1xf32, #tpu.memory_space<vmem>>, %arg9: memref<8x4xf32, #tpu.memory_space<vmem>>, %arg10: memref<8x1xf32, #tpu.memory_space<vmem>>, %arg11: memref<1x8x64xf32, #tpu.memory_space<vmem>>) attributes {dimension_semantics = [#tpu.dimension_semantics<parallel>], iteration_bounds = array<i64: 2>, scalar_prefetch = 0 : i64, scratch_operands = 0 : i64, tpu.core_type = #tpu.core_type<tc>, window_params = [{transform_indices = @transform_0, window_bounds = array<i64: 1, 4, 256>}, {pipeline_mode = #tpu.pipeline_mode<synchronous>, transform_indices = @transform_1, window_bounds = array<i64: 256, 64>}, {pipeline_mode = #tpu.pipeline_mode<synchronous>, transform_indices = @transform_2, window_bounds = array<i64: 4, 9>}, {pipeline_mode = #tpu.pipeline_mode<synchronous>, transform_indices = @transform_3, window_bounds = array<i64: 8, 4>}, {pipeline_mode = #tpu.pipeline_mode<synchronous>, transform_indices = @transform_4, window_bounds = array<i64: 8, 1>}, {pipeline_mode = #tpu.pipeline_mode<synchronous>, transform_indices = @transform_5, window_bounds = array<i64: 8, 9>}, {pipeline_mode = #tpu.pipeline_mode<synchronous>, transform_indices = @transform_6, window_bounds = array<i64: 8, 8>}, {pipeline_mode = #tpu.pipeline_mode<synchronous>, transform_indices = @transform_7, window_bounds = array<i64: 8, 1>}, {pipeline_mode = #tpu.pipeline_mode<synchronous>, transform_indices = @transform_8, window_bounds = array<i64: 8, 4>}, {pipeline_mode = #tpu.pipeline_mode<synchronous>, transform_indices = @transform_9, window_bounds = array<i64: 8, 1>}, {transform_indices = @transform_10, window_bounds = array<i64: 1, 8, 64>}]} {
    %c0 = arith.constant 0 : index
    %c0_0 = arith.constant 0 : index
    %c0_1 = arith.constant 0 : index
    %0 = vector.load %arg1[%c0, %c0_0, %c0_1] : memref<1x4x256xf32, #tpu.memory_space<vmem>>, vector<1x4x256xf32>
    %1 = vector.shape_cast %0 : vector<1x4x256xf32> to vector<4x256xf32>
    %2 = tpu.iota {dimensions = array<i32: 1>} : vector<1x256xi32>
    %c16_i32 = arith.constant 16 : i32
    %c0_i32 = arith.constant 0 : i32
    %3 = arith.cmpi eq, %c16_i32, %c0_i32 : i32
    %c1_i32 = arith.constant 1 : i32
    %4 = arith.select %3, %c1_i32, %c16_i32 : i32
    %5 = vector.broadcast %4 : i32 to vector<1x256xi32>
    %6 = arith.remsi %2, %5 : vector<1x256xi32>
    %c0_i32_2 = arith.constant 0 : i32
    %7 = vector.broadcast %c0_i32_2 : i32 to vector<1x256xi32>
    %8 = arith.cmpi ne, %6, %7 : vector<1x256xi32>
    %c0_i32_3 = arith.constant 0 : i32
    %9 = vector.broadcast %c0_i32_3 : i32 to vector<1x256xi32>
    %10 = arith.cmpi slt, %6, %9 : vector<1x256xi32>
    %c0_i32_4 = arith.constant 0 : i32
    %11 = arith.cmpi slt, %4, %c0_i32_4 : i32
    %12 = vector.broadcast %11 : i1 to vector<1x256xi1>
    %13 = vector.broadcast %12 : vector<1x256xi1> to vector<1x256xi1>
    %14 = arith.xori %10, %13 : vector<1x256xi1>
    %15 = arith.andi %14, %8 : vector<1x256xi1>
    %16 = vector.broadcast %4 : i32 to vector<1x256xi32>
    %17 = arith.addi %6, %16 : vector<1x256xi32>
    %18 = arith.select %15, %17, %6 : vector<1x256xi1>, vector<1x256xi32>
    %c15_i32 = arith.constant 15 : i32
    %19 = vector.broadcast %c15_i32 : i32 to vector<1x256xi32>
    %20 = arith.cmpi slt, %18, %19 : vector<1x256xi32>
    %c0_i32_5 = arith.constant 0 : i32
    %21 = vector.broadcast %c0_i32_5 : i32 to vector<1x256xi32>
    %22 = arith.cmpi sgt, %18, %21 : vector<1x256xi32>
    %c0_6 = arith.constant 0 : index
    %c0_7 = arith.constant 0 : index
    %23 = vector.load %arg4[%c0_6, %c0_7] : memref<8x4xf32, #tpu.memory_space<vmem>>, vector<8x4xf32>
    %c0_8 = arith.constant 0 : index
    %c0_9 = arith.constant 0 : index
    %24 = vector.load %arg3[%c0_8, %c0_9] : memref<4x9xf32, #tpu.memory_space<vmem>>, vector<4x9xf32>
    %cst = arith.constant 0.000000e+00 : f32
    %25 = vector.broadcast %cst : f32 to vector<4x17xf32>
    %26 = tpu.concatenate %25, %1, %25 in 1 : vector<4x17xf32>, vector<4x256xf32>, vector<4x17xf32> -> vector<4x290xf32>
    %27 = vector.extract_strided_slice %26 {offsets = [0, 0], sizes = [4, 256], strides = [1, 1]} : vector<4x290xf32> to vector<4x256xf32>
    %cst_10 = arith.constant 0.000000e+00 : f32
    %28 = vector.shape_cast %22 : vector<1x256xi1> to vector<1x256xi1>
    %29 = vector.broadcast %28 : vector<1x256xi1> to vector<4x256xi1>
    %30 = vector.broadcast %cst_10 : f32 to vector<4x256xf32>
    %31 = arith.select %29, %27, %30 : vector<4x256xi1>, vector<4x256xf32>
    %32 = vector.extract_strided_slice %24 {offsets = [0, 0], sizes = [4, 1], strides = [1, 1]} : vector<4x9xf32> to vector<4x1xf32>
    %33 = vector.broadcast %32 : vector<4x1xf32> to vector<4x256xf32>
    %34 = arith.mulf %31, %33 : vector<4x256xf32>
    %35 = vector.extract_strided_slice %26 {offsets = [0, 1], sizes = [4, 256], strides = [1, 1]} : vector<4x290xf32> to vector<4x256xf32>
    %36 = vector.extract_strided_slice %24 {offsets = [0, 1], sizes = [4, 1], strides = [1, 1]} : vector<4x9xf32> to vector<4x1xf32>
    %37 = vector.broadcast %36 : vector<4x1xf32> to vector<4x256xf32>
    %38 = arith.mulf %35, %37 : vector<4x256xf32>
    %39 = arith.addf %34, %38 : vector<4x256xf32>
    %40 = vector.extract_strided_slice %26 {offsets = [0, 2], sizes = [4, 256], strides = [1, 1]} : vector<4x290xf32> to vector<4x256xf32>
    %cst_11 = arith.constant 0.000000e+00 : f32
    %41 = vector.shape_cast %20 : vector<1x256xi1> to vector<1x256xi1>
    %42 = vector.broadcast %41 : vector<1x256xi1> to vector<4x256xi1>
    %43 = vector.broadcast %cst_11 : f32 to vector<4x256xf32>
    %44 = arith.select %42, %40, %43 : vector<4x256xi1>, vector<4x256xf32>
    %45 = vector.extract_strided_slice %24 {offsets = [0, 2], sizes = [4, 1], strides = [1, 1]} : vector<4x9xf32> to vector<4x1xf32>
    %46 = vector.broadcast %45 : vector<4x1xf32> to vector<4x256xf32>
    %47 = arith.mulf %44, %46 : vector<4x256xf32>
    %48 = arith.addf %39, %47 : vector<4x256xf32>
    %49 = vector.extract_strided_slice %26 {offsets = [0, 16], sizes = [4, 256], strides = [1, 1]} : vector<4x290xf32> to vector<4x256xf32>
    %cst_12 = arith.constant 0.000000e+00 : f32
    %50 = vector.shape_cast %22 : vector<1x256xi1> to vector<1x256xi1>
    %51 = vector.broadcast %50 : vector<1x256xi1> to vector<4x256xi1>
    %52 = vector.broadcast %cst_12 : f32 to vector<4x256xf32>
    %53 = arith.select %51, %49, %52 : vector<4x256xi1>, vector<4x256xf32>
    %54 = vector.extract_strided_slice %24 {offsets = [0, 3], sizes = [4, 1], strides = [1, 1]} : vector<4x9xf32> to vector<4x1xf32>
    %55 = vector.broadcast %54 : vector<4x1xf32> to vector<4x256xf32>
    %56 = arith.mulf %53, %55 : vector<4x256xf32>
    %57 = arith.addf %48, %56 : vector<4x256xf32>
    %58 = vector.extract_strided_slice %26 {offsets = [0, 17], sizes = [4, 256], strides = [1, 1]} : vector<4x290xf32> to vector<4x256xf32>
    %59 = vector.extract_strided_slice %24 {offsets = [0, 4], sizes = [4, 1], strides = [1, 1]} : vector<4x9xf32> to vector<4x1xf32>
    %60 = vector.broadcast %59 : vector<4x1xf32> to vector<4x256xf32>
    %61 = arith.mulf %58, %60 : vector<4x256xf32>
    %62 = arith.addf %57, %61 : vector<4x256xf32>
    %63 = vector.extract_strided_slice %26 {offsets = [0, 18], sizes = [4, 256], strides = [1, 1]} : vector<4x290xf32> to vector<4x256xf32>
    %cst_13 = arith.constant 0.000000e+00 : f32
    %64 = vector.shape_cast %20 : vector<1x256xi1> to vector<1x256xi1>
    %65 = vector.broadcast %64 : vector<1x256xi1> to vector<4x256xi1>
    %66 = vector.broadcast %cst_13 : f32 to vector<4x256xf32>
    %67 = arith.select %65, %63, %66 : vector<4x256xi1>, vector<4x256xf32>
    %68 = vector.extract_strided_slice %24 {offsets = [0, 5], sizes = [4, 1], strides = [1, 1]} : vector<4x9xf32> to vector<4x1xf32>
    %69 = vector.broadcast %68 : vector<4x1xf32> to vector<4x256xf32>
    %70 = arith.mulf %67, %69 : vector<4x256xf32>
    %71 = arith.addf %62, %70 : vector<4x256xf32>
    %72 = vector.extract_strided_slice %26 {offsets = [0, 32], sizes = [4, 256], strides = [1, 1]} : vector<4x290xf32> to vector<4x256xf32>
    %cst_14 = arith.constant 0.000000e+00 : f32
    %73 = vector.shape_cast %22 : vector<1x256xi1> to vector<1x256xi1>
    %74 = vector.broadcast %73 : vector<1x256xi1> to vector<4x256xi1>
    %75 = vector.broadcast %cst_14 : f32 to vector<4x256xf32>
    %76 = arith.select %74, %72, %75 : vector<4x256xi1>, vector<4x256xf32>
    %77 = vector.extract_strided_slice %24 {offsets = [0, 6], sizes = [4, 1], strides = [1, 1]} : vector<4x9xf32> to vector<4x1xf32>
    %78 = vector.broadcast %77 : vector<4x1xf32> to vector<4x256xf32>
    %79 = arith.mulf %76, %78 : vector<4x256xf32>
    %80 = arith.addf %71, %79 : vector<4x256xf32>
    %81 = vector.extract_strided_slice %26 {offsets = [0, 33], sizes = [4, 256], strides = [1, 1]} : vector<4x290xf32> to vector<4x256xf32>
    %82 = vector.extract_strided_slice %24 {offsets = [0, 7], sizes = [4, 1], strides = [1, 1]} : vector<4x9xf32> to vector<4x1xf32>
    %83 = vector.broadcast %82 : vector<4x1xf32> to vector<4x256xf32>
    %84 = arith.mulf %81, %83 : vector<4x256xf32>
    %85 = arith.addf %80, %84 : vector<4x256xf32>
    %86 = vector.extract_strided_slice %26 {offsets = [0, 34], sizes = [4, 256], strides = [1, 1]} : vector<4x290xf32> to vector<4x256xf32>
    %cst_15 = arith.constant 0.000000e+00 : f32
    %87 = vector.shape_cast %20 : vector<1x256xi1> to vector<1x256xi1>
    %88 = vector.broadcast %87 : vector<1x256xi1> to vector<4x256xi1>
    %89 = vector.broadcast %cst_15 : f32 to vector<4x256xf32>
    %90 = arith.select %88, %86, %89 : vector<4x256xi1>, vector<4x256xf32>
    %91 = vector.extract_strided_slice %24 {offsets = [0, 8], sizes = [4, 1], strides = [1, 1]} : vector<4x9xf32> to vector<4x1xf32>
    %92 = vector.broadcast %91 : vector<4x1xf32> to vector<4x256xf32>
    %93 = arith.mulf %90, %92 : vector<4x256xf32>
    %94 = arith.addf %85, %93 : vector<4x256xf32>
    %cst_16 = arith.constant dense<0.000000e+00> : vector<8x256xf32>
    %95 = tpu.matmul %23, %94, %cst_16 {dimension_numbers = #tpu.dot_dimension_numbers<[1], [0], [0], [1], [0, 0, 1, 1], [], []>} : vector<8x4xf32>, vector<4x256xf32>, vector<8x256xf32> -> vector<8x256xf32>
    %c0_17 = arith.constant 0 : index
    %c0_18 = arith.constant 0 : index
    %96 = vector.load %arg5[%c0_17, %c0_18] : memref<8x1xf32, #tpu.memory_space<vmem>>, vector<8x1xf32>
    %97 = vector.broadcast %96 : vector<8x1xf32> to vector<8x256xf32>
    %98 = arith.addf %95, %97 : vector<8x256xf32>
    %cst_19 = arith.constant 0.000000e+00 : f32
    %99 = vector.broadcast %cst_19 : f32 to vector<8x256xf32>
    %100 = arith.maximumf %98, %99 : vector<8x256xf32>
    %c0_20 = arith.constant 0 : index
    %c0_21 = arith.constant 0 : index
    %101 = vector.load %arg7[%c0_20, %c0_21] : memref<8x8xf32, #tpu.memory_space<vmem>>, vector<8x8xf32>
    %c0_22 = arith.constant 0 : index
    %c0_23 = arith.constant 0 : index
    %102 = vector.load %arg6[%c0_22, %c0_23] : memref<8x9xf32, #tpu.memory_space<vmem>>, vector<8x9xf32>
    %cst_24 = arith.constant 0.000000e+00 : f32
    %103 = vector.broadcast %cst_24 : f32 to vector<8x17xf32>
    %104 = tpu.concatenate %103, %100, %103 in 1 : vector<8x17xf32>, vector<8x256xf32>, vector<8x17xf32> -> vector<8x290xf32>
    %105 = vector.extract_strided_slice %104 {offsets = [0, 0], sizes = [8, 256], strides = [1, 1]} : vector<8x290xf32> to vector<8x256xf32>
    %cst_25 = arith.constant 0.000000e+00 : f32
    %106 = vector.shape_cast %22 : vector<1x256xi1> to vector<1x256xi1>
    %107 = vector.broadcast %106 : vector<1x256xi1> to vector<8x256xi1>
    %108 = vector.broadcast %cst_25 : f32 to vector<8x256xf32>
    %109 = arith.select %107, %105, %108 : vector<8x256xi1>, vector<8x256xf32>
    %110 = vector.extract_strided_slice %102 {offsets = [0, 0], sizes = [8, 1], strides = [1, 1]} : vector<8x9xf32> to vector<8x1xf32>
    %111 = vector.broadcast %110 : vector<8x1xf32> to vector<8x256xf32>
    %112 = arith.mulf %109, %111 : vector<8x256xf32>
    %113 = vector.extract_strided_slice %104 {offsets = [0, 1], sizes = [8, 256], strides = [1, 1]} : vector<8x290xf32> to vector<8x256xf32>
    %114 = vector.extract_strided_slice %102 {offsets = [0, 1], sizes = [8, 1], strides = [1, 1]} : vector<8x9xf32> to vector<8x1xf32>
    %115 = vector.broadcast %114 : vector<8x1xf32> to vector<8x256xf32>
    %116 = arith.mulf %113, %115 : vector<8x256xf32>
    %117 = arith.addf %112, %116 : vector<8x256xf32>
    %118 = vector.extract_strided_slice %104 {offsets = [0, 2], sizes = [8, 256], strides = [1, 1]} : vector<8x290xf32> to vector<8x256xf32>
    %cst_26 = arith.constant 0.000000e+00 : f32
    %119 = vector.shape_cast %20 : vector<1x256xi1> to vector<1x256xi1>
    %120 = vector.broadcast %119 : vector<1x256xi1> to vector<8x256xi1>
    %121 = vector.broadcast %cst_26 : f32 to vector<8x256xf32>
    %122 = arith.select %120, %118, %121 : vector<8x256xi1>, vector<8x256xf32>
    %123 = vector.extract_strided_slice %102 {offsets = [0, 2], sizes = [8, 1], strides = [1, 1]} : vector<8x9xf32> to vector<8x1xf32>
    %124 = vector.broadcast %123 : vector<8x1xf32> to vector<8x256xf32>
    %125 = arith.mulf %122, %124 : vector<8x256xf32>
    %126 = arith.addf %117, %125 : vector<8x256xf32>
    %127 = vector.extract_strided_slice %104 {offsets = [0, 16], sizes = [8, 256], strides = [1, 1]} : vector<8x290xf32> to vector<8x256xf32>
    %cst_27 = arith.constant 0.000000e+00 : f32
    %128 = vector.shape_cast %22 : vector<1x256xi1> to vector<1x256xi1>
    %129 = vector.broadcast %128 : vector<1x256xi1> to vector<8x256xi1>
    %130 = vector.broadcast %cst_27 : f32 to vector<8x256xf32>
    %131 = arith.select %129, %127, %130 : vector<8x256xi1>, vector<8x256xf32>
    %132 = vector.extract_strided_slice %102 {offsets = [0, 3], sizes = [8, 1], strides = [1, 1]} : vector<8x9xf32> to vector<8x1xf32>
    %133 = vector.broadcast %132 : vector<8x1xf32> to vector<8x256xf32>
    %134 = arith.mulf %131, %133 : vector<8x256xf32>
    %135 = arith.addf %126, %134 : vector<8x256xf32>
    %136 = vector.extract_strided_slice %104 {offsets = [0, 17], sizes = [8, 256], strides = [1, 1]} : vector<8x290xf32> to vector<8x256xf32>
    %137 = vector.extract_strided_slice %102 {offsets = [0, 4], sizes = [8, 1], strides = [1, 1]} : vector<8x9xf32> to vector<8x1xf32>
    %138 = vector.broadcast %137 : vector<8x1xf32> to vector<8x256xf32>
    %139 = arith.mulf %136, %138 : vector<8x256xf32>
    %140 = arith.addf %135, %139 : vector<8x256xf32>
    %141 = vector.extract_strided_slice %104 {offsets = [0, 18], sizes = [8, 256], strides = [1, 1]} : vector<8x290xf32> to vector<8x256xf32>
    %cst_28 = arith.constant 0.000000e+00 : f32
    %142 = vector.shape_cast %20 : vector<1x256xi1> to vector<1x256xi1>
    %143 = vector.broadcast %142 : vector<1x256xi1> to vector<8x256xi1>
    %144 = vector.broadcast %cst_28 : f32 to vector<8x256xf32>
    %145 = arith.select %143, %141, %144 : vector<8x256xi1>, vector<8x256xf32>
    %146 = vector.extract_strided_slice %102 {offsets = [0, 5], sizes = [8, 1], strides = [1, 1]} : vector<8x9xf32> to vector<8x1xf32>
    %147 = vector.broadcast %146 : vector<8x1xf32> to vector<8x256xf32>
    %148 = arith.mulf %145, %147 : vector<8x256xf32>
    %149 = arith.addf %140, %148 : vector<8x256xf32>
    %150 = vector.extract_strided_slice %104 {offsets = [0, 32], sizes = [8, 256], strides = [1, 1]} : vector<8x290xf32> to vector<8x256xf32>
    %cst_29 = arith.constant 0.000000e+00 : f32
    %151 = vector.shape_cast %22 : vector<1x256xi1> to vector<1x256xi1>
    %152 = vector.broadcast %151 : vector<1x256xi1> to vector<8x256xi1>
    %153 = vector.broadcast %cst_29 : f32 to vector<8x256xf32>
    %154 = arith.select %152, %150, %153 : vector<8x256xi1>, vector<8x256xf32>
    %155 = vector.extract_strided_slice %102 {offsets = [0, 6], sizes = [8, 1], strides = [1, 1]} : vector<8x9xf32> to vector<8x1xf32>
    %156 = vector.broadcast %155 : vector<8x1xf32> to vector<8x256xf32>
    %157 = arith.mulf %154, %156 : vector<8x256xf32>
    %158 = arith.addf %149, %157 : vector<8x256xf32>
    %159 = vector.extract_strided_slice %104 {offsets = [0, 33], sizes = [8, 256], strides = [1, 1]} : vector<8x290xf32> to vector<8x256xf32>
    %160 = vector.extract_strided_slice %102 {offsets = [0, 7], sizes = [8, 1], strides = [1, 1]} : vector<8x9xf32> to vector<8x1xf32>
    %161 = vector.broadcast %160 : vector<8x1xf32> to vector<8x256xf32>
    %162 = arith.mulf %159, %161 : vector<8x256xf32>
    %163 = arith.addf %158, %162 : vector<8x256xf32>
    %164 = vector.extract_strided_slice %104 {offsets = [0, 34], sizes = [8, 256], strides = [1, 1]} : vector<8x290xf32> to vector<8x256xf32>
    %cst_30 = arith.constant 0.000000e+00 : f32
    %165 = vector.shape_cast %20 : vector<1x256xi1> to vector<1x256xi1>
    %166 = vector.broadcast %165 : vector<1x256xi1> to vector<8x256xi1>
    %167 = vector.broadcast %cst_30 : f32 to vector<8x256xf32>
    %168 = arith.select %166, %164, %167 : vector<8x256xi1>, vector<8x256xf32>
    %169 = vector.extract_strided_slice %102 {offsets = [0, 8], sizes = [8, 1], strides = [1, 1]} : vector<8x9xf32> to vector<8x1xf32>
    %170 = vector.broadcast %169 : vector<8x1xf32> to vector<8x256xf32>
    %171 = arith.mulf %168, %170 : vector<8x256xf32>
    %172 = arith.addf %163, %171 : vector<8x256xf32>
    %cst_31 = arith.constant dense<0.000000e+00> : vector<8x256xf32>
    %173 = tpu.matmul %101, %172, %cst_31 {dimension_numbers = #tpu.dot_dimension_numbers<[1], [0], [0], [1], [0, 0, 1, 1], [], []>} : vector<8x8xf32>, vector<8x256xf32>, vector<8x256xf32> -> vector<8x256xf32>
    %c0_32 = arith.constant 0 : index
    %c0_33 = arith.constant 0 : index
    %174 = vector.load %arg8[%c0_32, %c0_33] : memref<8x1xf32, #tpu.memory_space<vmem>>, vector<8x1xf32>
    %175 = vector.broadcast %174 : vector<8x1xf32> to vector<8x256xf32>
    %176 = arith.addf %173, %175 : vector<8x256xf32>
    %cst_34 = arith.constant 0.000000e+00 : f32
    %177 = vector.broadcast %cst_34 : f32 to vector<8x256xf32>
    %178 = arith.maximumf %176, %177 : vector<8x256xf32>
    %cst_35 = arith.constant 0.000000e+00 : f32
    %179 = vector.broadcast %cst_35 : f32 to vector<8x17xf32>
    %180 = tpu.concatenate %179, %178, %179 in 1 : vector<8x17xf32>, vector<8x256xf32>, vector<8x17xf32> -> vector<8x290xf32>
    %181 = vector.extract_strided_slice %180 {offsets = [0, 0], sizes = [8, 256], strides = [1, 1]} : vector<8x290xf32> to vector<8x256xf32>
    %cst_36 = arith.constant 0.000000e+00 : f32
    %182 = vector.shape_cast %22 : vector<1x256xi1> to vector<1x256xi1>
    %183 = vector.broadcast %182 : vector<1x256xi1> to vector<8x256xi1>
    %184 = vector.broadcast %cst_36 : f32 to vector<8x256xf32>
    %185 = arith.select %183, %181, %184 : vector<8x256xi1>, vector<8x256xf32>
    %186 = vector.extract_strided_slice %180 {offsets = [0, 1], sizes = [8, 256], strides = [1, 1]} : vector<8x290xf32> to vector<8x256xf32>
    %187 = arith.maximumf %185, %186 : vector<8x256xf32>
    %188 = vector.extract_strided_slice %180 {offsets = [0, 2], sizes = [8, 256], strides = [1, 1]} : vector<8x290xf32> to vector<8x256xf32>
    %cst_37 = arith.constant 0.000000e+00 : f32
    %189 = vector.shape_cast %20 : vector<1x256xi1> to vector<1x256xi1>
    %190 = vector.broadcast %189 : vector<1x256xi1> to vector<8x256xi1>
    %191 = vector.broadcast %cst_37 : f32 to vector<8x256xf32>
    %192 = arith.select %190, %188, %191 : vector<8x256xi1>, vector<8x256xf32>
    %193 = arith.maximumf %187, %192 : vector<8x256xf32>
    %194 = vector.extract_strided_slice %180 {offsets = [0, 16], sizes = [8, 256], strides = [1, 1]} : vector<8x290xf32> to vector<8x256xf32>
    %cst_38 = arith.constant 0.000000e+00 : f32
    %195 = vector.shape_cast %22 : vector<1x256xi1> to vector<1x256xi1>
    %196 = vector.broadcast %195 : vector<1x256xi1> to vector<8x256xi1>
    %197 = vector.broadcast %cst_38 : f32 to vector<8x256xf32>
    %198 = arith.select %196, %194, %197 : vector<8x256xi1>, vector<8x256xf32>
    %199 = arith.maximumf %193, %198 : vector<8x256xf32>
    %200 = vector.extract_strided_slice %180 {offsets = [0, 17], sizes = [8, 256], strides = [1, 1]} : vector<8x290xf32> to vector<8x256xf32>
    %201 = arith.maximumf %199, %200 : vector<8x256xf32>
    %202 = vector.extract_strided_slice %180 {offsets = [0, 18], sizes = [8, 256], strides = [1, 1]} : vector<8x290xf32> to vector<8x256xf32>
    %cst_39 = arith.constant 0.000000e+00 : f32
    %203 = vector.shape_cast %20 : vector<1x256xi1> to vector<1x256xi1>
    %204 = vector.broadcast %203 : vector<1x256xi1> to vector<8x256xi1>
    %205 = vector.broadcast %cst_39 : f32 to vector<8x256xf32>
    %206 = arith.select %204, %202, %205 : vector<8x256xi1>, vector<8x256xf32>
    %207 = arith.maximumf %201, %206 : vector<8x256xf32>
    %208 = vector.extract_strided_slice %180 {offsets = [0, 32], sizes = [8, 256], strides = [1, 1]} : vector<8x290xf32> to vector<8x256xf32>
    %cst_40 = arith.constant 0.000000e+00 : f32
    %209 = vector.shape_cast %22 : vector<1x256xi1> to vector<1x256xi1>
    %210 = vector.broadcast %209 : vector<1x256xi1> to vector<8x256xi1>
    %211 = vector.broadcast %cst_40 : f32 to vector<8x256xf32>
    %212 = arith.select %210, %208, %211 : vector<8x256xi1>, vector<8x256xf32>
    %213 = arith.maximumf %207, %212 : vector<8x256xf32>
    %214 = vector.extract_strided_slice %180 {offsets = [0, 33], sizes = [8, 256], strides = [1, 1]} : vector<8x290xf32> to vector<8x256xf32>
    %215 = arith.maximumf %213, %214 : vector<8x256xf32>
    %216 = vector.extract_strided_slice %180 {offsets = [0, 34], sizes = [8, 256], strides = [1, 1]} : vector<8x290xf32> to vector<8x256xf32>
    %cst_41 = arith.constant 0.000000e+00 : f32
    %217 = vector.shape_cast %20 : vector<1x256xi1> to vector<1x256xi1>
    %218 = vector.broadcast %217 : vector<1x256xi1> to vector<8x256xi1>
    %219 = vector.broadcast %cst_41 : f32 to vector<8x256xf32>
    %220 = arith.select %218, %216, %219 : vector<8x256xi1>, vector<8x256xf32>
    %221 = arith.maximumf %215, %220 : vector<8x256xf32>
    %c0_42 = arith.constant 0 : index
    %c0_43 = arith.constant 0 : index
    %222 = vector.load %arg2[%c0_42, %c0_43] : memref<256x64xf32, #tpu.memory_space<vmem>>, vector<256x64xf32>
    %cst_44 = arith.constant dense<0.000000e+00> : vector<8x64xf32>
    %223 = tpu.matmul %221, %222, %cst_44 {dimension_numbers = #tpu.dot_dimension_numbers<[1], [0], [0], [1], [0, 0, 1, 1], [], []>} : vector<8x256xf32>, vector<256x64xf32>, vector<8x64xf32> -> vector<8x64xf32>
    %cst_45 = arith.constant dense<0.000000e+00> : vector<4x64xf32>
    %224 = tpu.matmul %1, %222, %cst_45 {dimension_numbers = #tpu.dot_dimension_numbers<[1], [0], [0], [1], [0, 0, 1, 1], [], []>} : vector<4x256xf32>, vector<256x64xf32>, vector<4x64xf32> -> vector<4x64xf32>
    %c0_46 = arith.constant 0 : index
    %c0_47 = arith.constant 0 : index
    %225 = vector.load %arg9[%c0_46, %c0_47] : memref<8x4xf32, #tpu.memory_space<vmem>>, vector<8x4xf32>
    %cst_48 = arith.constant dense<0.000000e+00> : vector<8x64xf32>
    %226 = tpu.matmul %225, %224, %cst_48 {dimension_numbers = #tpu.dot_dimension_numbers<[1], [0], [0], [1], [0, 0, 1, 1], [], []>} : vector<8x4xf32>, vector<4x64xf32>, vector<8x64xf32> -> vector<8x64xf32>
    %c0_49 = arith.constant 0 : index
    %c0_50 = arith.constant 0 : index
    %227 = vector.load %arg10[%c0_49, %c0_50] : memref<8x1xf32, #tpu.memory_space<vmem>>, vector<8x1xf32>
    %228 = vector.broadcast %227 : vector<8x1xf32> to vector<8x64xf32>
    %229 = arith.addf %226, %228 : vector<8x64xf32>
    %230 = arith.addf %229, %223 : vector<8x64xf32>
    %c0_51 = arith.constant 0 : index
    %c0_52 = arith.constant 0 : index
    %c0_53 = arith.constant 0 : index
    %231 = vector.load %arg11[%c0_51, %c0_52, %c0_53] : memref<1x8x64xf32, #tpu.memory_space<vmem>>, vector<1x8x64xf32>
    %232 = vector.shape_cast %231 : vector<1x8x64xf32> to vector<8x64xf32>
    %233 = vector.shape_cast %230 : vector<8x64xf32> to vector<1x8x64xf32>
    tpu.vector_store %arg11[%c0_51, %c0_52, %c0_53], %233 {strides = array<i32>} : memref<1x8x64xf32, #tpu.memory_space<vmem>>, vector<1x8x64xf32>,
    return
  }
  func.func @transform_0(%arg0: i32) -> (i32, i32, i32) {
    %c0_i32 = arith.constant 0 : i32
    %c0_i32_0 = arith.constant 0 : i32
    %c0_i32_1 = arith.constant 0 : i32
    return %arg0, %c0_i32, %c0_i32_0 : i32, i32, i32
  }
  func.func @transform_1(%arg0: i32) -> (i32, i32) {
    %c0_i32 = arith.constant 0 : i32
    %c0_i32_0 = arith.constant 0 : i32
    %c0_i32_1 = arith.constant 0 : i32
    return %c0_i32, %c0_i32_0 : i32, i32
  }
  func.func @transform_2(%arg0: i32) -> (i32, i32) {
    %c0_i32 = arith.constant 0 : i32
    %c0_i32_0 = arith.constant 0 : i32
    %c0_i32_1 = arith.constant 0 : i32
    return %c0_i32, %c0_i32_0 : i32, i32
  }
  func.func @transform_3(%arg0: i32) -> (i32, i32) {
    %c0_i32 = arith.constant 0 : i32
    %c0_i32_0 = arith.constant 0 : i32
    %c0_i32_1 = arith.constant 0 : i32
    return %c0_i32, %c0_i32_0 : i32, i32
  }
  func.func @transform_4(%arg0: i32) -> (i32, i32) {
    %c0_i32 = arith.constant 0 : i32
    %c0_i32_0 = arith.constant 0 : i32
    %c0_i32_1 = arith.constant 0 : i32
    return %c0_i32, %c0_i32_0 : i32, i32
  }
  func.func @transform_5(%arg0: i32) -> (i32, i32) {
    %c0_i32 = arith.constant 0 : i32
    %c0_i32_0 = arith.constant 0 : i32
    %c0_i32_1 = arith.constant 0 : i32
    return %c0_i32, %c0_i32_0 : i32, i32
  }
  func.func @transform_6(%arg0: i32) -> (i32, i32) {
    %c0_i32 = arith.constant 0 : i32
    %c0_i32_0 = arith.constant 0 : i32
    %c0_i32_1 = arith.constant 0 : i32
    return %c0_i32, %c0_i32_0 : i32, i32
  }
  func.func @transform_7(%arg0: i32) -> (i32, i32) {
    %c0_i32 = arith.constant 0 : i32
    %c0_i32_0 = arith.constant 0 : i32
    %c0_i32_1 = arith.constant 0 : i32
    return %c0_i32, %c0_i32_0 : i32, i32
  }
  func.func @transform_8(%arg0: i32) -> (i32, i32) {
    %c0_i32 = arith.constant 0 : i32
    %c0_i32_0 = arith.constant 0 : i32
    %c0_i32_1 = arith.constant 0 : i32
    return %c0_i32, %c0_i32_0 : i32, i32
  }
  func.func @transform_9(%arg0: i32) -> (i32, i32) {
    %c0_i32 = arith.constant 0 : i32
    %c0_i32_0 = arith.constant 0 : i32
    %c0_i32_1 = arith.constant 0 : i32
    return %c0_i32, %c0_i32_0 : i32, i32
  }
  func.func @transform_10(%arg0: i32) -> (i32, i32, i32) {
    %c0_i32 = arith.constant 0 : i32
    %c0_i32_0 = arith.constant 0 : i32
    %c0_i32_1 = arith.constant 0 : i32
    return %arg0, %c0_i32, %c0_i32_0 : i32, i32, i32
  }
}

</mosaic_0001>

<bundles_post_ra>
// kernel: tpu_custom_call.1
= control target key start
LH: loop header
LB: loop body
LE: loop exit
PB: predicated region body
PF: predicated region fallthrough
CT: control target
= control target key end

     0   :  { %s2402_s0 = inlined_call_operand.vmem [shape: f32[2,4,256], index: 0, kind: input, shape index: {}]   ;;  %s2403_s1 = inlined_call_operand.vmem [shape: f32[256,64], index: 1, kind: input, shape index: {}]   ;;  %s2404_s2 = inlined_call_operand.vmem [shape: f32[4,9], index: 2, kind: input, shape index: {}]   ;;  %s2405_s3 = inlined_call_operand.vmem [shape: f32[8,4], index: 3, kind: input, shape index: {}]   ;;  %s2406_s4 = inlined_call_operand.vmem [shape: f32[8,1], index: 4, kind: input, shape index: {}]   ;;  %s2407_s5 = inlined_call_operand.vmem [shape: f32[8,9], index: 5, kind: input, shape index: {}]   ;;  %s2408_s6 = inlined_call_operand.vmem [shape: f32[8,8], index: 6, kind: input, shape index: {}]   ;;  %s2409_s7 = inlined_call_operand.vmem [shape: f32[8,1], index: 7, kind: input, shape index: {}]   ;;  %s2410_s8 = inlined_call_operand.vmem [shape: f32[8,4], index: 8, kind: input, shape index: {}]   ;;  %s2411_s9 = inlined_call_operand.vmem [shape: f32[8,1], index: 9, kind: input, shape index: {}]   ;;  %s2412_s10 = inlined_call_operand.hbm [shape: f32[2,8,64], index: 10, kind: output, shape index: {}]  }
   0x1   :  { %2430 = sst [smem:[#allocation5_spill]] %s2402_s0 }
   0x2   :  { %2431 = sst [smem:[#allocation6_spill]] %s2404_s2 }
   0x3   :  { %15 = vsyncpa [#allocation3], 0 }
   0x4   :  { %17 = vsyncpa [#allocation3 + $0x1], 0  ;;  %s1841_s13 = smov 0   ;;  %s1843_s14 = smov 0  }
   0x5   :  { %s1845_s15 = smov 0   ;;  %s1847_s16 = smov 0  }
   0x6 LB: > { %s1862_s17 = sadd.s32 4294967295, %s1763_s16   ;;  %s1416_s18 = sadd.s32 4294967294, %s1763_s16   ;;  %s1763_s16 = sphi %s1847_s16, %s2456_s16   ;;  %s1759_s15 = sphi %s1845_s15, %s2455_s15   ;;  %s1755_s14 = sphi %s1843_s14, %s2454_s14   ;;  %s1751_s13 = sphi %s1841_s13, %s2453_s13  }
   0x7   : > { %s1866_s19 = sadd.s32 1, %s1763_s16   ;;  %s245_s20 = sadd.s32 1, %s1759_s15 }
   0x8   : > { %s242_s21 = ssub.s32 %s1763_s16, %s1866_s19  ;;  %p255_p0 = scmp.ne.s32.totalorder %s1759_s15, %s1755_s14 }
   0x9   : > { %p243_p1 = scmp.eq.s32.totalorder %s242_s21, 0  ;;  %p256_p2 = scmp.eq.s32.totalorder %s1862_s17, 1 }
   0xa   : > { %p261_p3 = scmp.ne.s32.totalorder %s1755_s14, %s1751_s13  ;;  %p262_p4 = scmp.eq.s32.totalorder %s1416_s18, 1 }
   0xb   : > { %s1877_s22 = scalar_select %p243_p1, %s1759_s15, %s245_s20  }
   0xc   : > { %p1879_p5 = por %p256_p2, %p255_p0  ;;  %p1883_p6 = por %p262_p4, %p261_p3 }
   0xd   : > { %p1419_p7 = scmp.ge.s32.totalorder %s1763_s16, 1  ;;  %p315_p8 = scmp.lt.s32.totalorder %s1763_s16, 3 }
   0xf   : > { %p316_p9 = pnand %p1419_p7, %p315_p8 }
  0x10   : > { %s2434_s2 = sld [smem:[#allocation6_spill]] (!%p316_p9)  ;;  %p353_p10 = scmp.lt.s32.totalorder (!%p316_p9), %s1862_s17, 1  ;;  %v1765_v1 = vmov (!%p316_p9), 1   ;;  %v1766_v2 = vmov (!%p316_p9), 4   ;;  %v1767_v4 = vmov (!%p316_p9), 7   ;;  %v1769_v6 = vmov (!%p316_p9), 3  }
  0x11   : > { %319 = sbr.rel (%p316_p9) target bundleno = 1549 (0x60d), region = 60  ;;  %1634 = vset.pattern.permute.xlu0 (!%p316_p9), %v1765_v1  ;;  %1635 = vset.pattern.permute.xlu1 (!%p316_p9), %v1766_v2  ;;  %s2435_s0 = sld [smem:[#allocation5_spill]] (!%p316_p9)  ;;  %v1770_v7 = vmov (!%p316_p9), 0   ;;  %v1771_v8 = vmov (!%p316_p9), 6   ;;  %v1772_v9 = vmov (!%p316_p9), 2   ;;  %v1773_v10 = vmov (!%p316_p9), 5  }
  0x12   : > { %s2429_s12 = smov (!%p316_p9), 17   ;;  %v1774_v11 = vmov (!%p316_p9), 8   ;;  %vm398_vm0 = vcmask (!%p316_p9), 138240   ;;  %s2427_s18 = smov (!%p316_p9), 126   ;;  %v1783_v27 = vmov (!%p316_p9), 0.0   ;;  %v598_v28 = vld [vmem:[%s2406_s4] sm:$0xff] (!%p316_p9)  ;;  %v359_v44 = vlaneseq (!%p316_p9) }
  0x13   : > { %s2425_s20 = smov (!%p316_p9), 112   ;;  %s2423_s21 = smov (!%p316_p9), 110   ;;  %679 = vmatprep.mubr.f32.mxu0 (!%p316_p9), %v1783_v27  ;;  %953 = vmatprep.mubr.f32.mxu1 (!%p316_p9), %v1783_v27  ;;  %v1972_v31 = vld [vmem:[%s2407_s5] sm:$0xff] (!%p316_p9)  ;;  %vm453_vm1 = vcmask (!%p316_p9), 1031168   ;;  %vm434_vm3 = vcmask (!%p316_p9), 1039360   ;;  %vm474_vm5 = vcmask (!%p316_p9), 916480  }
  0x14   : > { %s2421_s25 = smov (!%p316_p9), 96   ;;  %s2417_s26 = smov (!%p316_p9), 94   ;;  %v360_v47 = vand.u32 (!%p316_p9), 127, %v359_v44  ;;  %vm518_vm8 = vcmask (!%p316_p9), 900096   ;;  %vm505_vm9 = vcmask (!%p316_p9), 908288   ;;  %vm539_vm10 = vcmask (!%p316_p9), 785408  }
  0x15   : > { %s2419_s29 = smov (!%p316_p9), 95   ;;  %vm583_vm11 = vcmask (!%p316_p9), 769024   ;;  %vm570_vm12 = vcmask (!%p316_p9), 777216   ;;  %vm608_vm13 = vcmask (!%p316_p9), 1043456   ;;  %vm604_vm14 = vcmask (!%p316_p9), 31744   ;;  %s2444_s30 = smov (!%p316_p9), 127  }
  0x16   : > { %v391_v0 = vld [vmem:[%s2434_s2] sm:$0xf] (!%p316_p9)  ;;  %v361_v50 = vadd.s32 (!%p316_p9), 128, %v360_v47  ;;  %v366_v51 = vand.u32 (!%p316_p9), 15, %v360_v47  ;;  %vm885_vm15 = vcmask (!%p316_p9), 64512   ;;  %s2446_s2 = smov (!%p316_p9), 17  }
  0x17   : > { %419 = vperm.xlu0 (!%p316_p9), %1634, %v391_v0  }
  0x18   : > { %s354_s27 = scalar_select %p353_p10, %s1862_s17, 1  ;;  %v373_v54 = vand.u32 15, %v361_v50  ;;  %vm1988_vm2 = vcmp.gt.s32.totalorder %v366_v51, 0  ;;  %vm1992_vm4 = vcmp.lt.s32.totalorder %v366_v51, 15 }
  0x1a   : > { %s1433_s28 = sshll.u32 %s354_s27, 3  ;;  %s2415_s27 = smov 127   ;;  %vm2001_vm6 = vcmp.gt.s32.totalorder %v373_v54, 0  ;;  %vm2005_vm7 = vcmp.lt.s32.totalorder %v373_v54, 15 }
  0x1b   : > { %s357_s11 = scalar_lea.vmem %s2435_s0, %s1433_s28  ;;  %1636 = vset.pattern.permute.xlu0 %v1767_v4  ;;  %s2413_s28 = smov 111  }
  0x1c   : > { %v1898_v3 = vld [vmem:[%s357_s11] sm:$0xff]  ;;  %s2445_s11 = smov 111   ;;  %s350_s0 = sand.u32 1, %s1755_s14  }
  0x1d   : > { %394 = vrot.lane.b32.xlu0 %v1898_v3, %s2429_s12  ;;  %v1905_v5 = vcombine.high %v1898_v3, %v1898_v3 }
  0x1f   : > { %396 = vrot.lane.b32.xlu1 %v1905_v5, %s2429_s12 }
  0x21   : > { %555 = vperm.xlu0 %1636, %v391_v0  }
  0x23   : > { %490 = vperm.xlu1 %1635, %v391_v0  }
  0x25   : > { %1639 = vset.pattern.permute.xlu0 %v1769_v6 }
  0x26   : > { %482 = vperm.xlu0 %1639, %v391_v0  }
  0x27   : > { %1637 = vset.pattern.permute.xlu1 %v1770_v7 }
  0x28   : > { %413 = vperm.xlu1 %1637, %v391_v0  }
  0x2a   : > { %1641 = vset.pattern.permute.xlu0 %v1771_v8 }
  0x2b   : > { %547 = vperm.xlu0 %1641, %v391_v0  }
  0x2c   : > { %1638 = vset.pattern.permute.xlu1 %v1772_v9 }
  0x2d   : > { %461 = vperm.xlu1 %1638, %v391_v0  }
  0x2f   : > { %1643 = vset.pattern.permute.xlu0 %v1770_v7 }
  0x31   : > { %1640 = vset.pattern.permute.xlu1 %v1773_v10 }
  0x32   : > { %526 = vperm.xlu1 %1640, %v391_v0  }
  0x36   : > { %1642 = vset.pattern.permute.xlu1 %v1774_v11 }
  0x37   : > { %591 = vperm.xlu1 %1642, %v391_v0  }
  0x3b   : > { %1644 = vset.pattern.permute.xlu1 %v1765_v1 }
  0x91   : > { %v397_v15 = vpop.permute.xlu1 %396 }
  0x92   : > { %v404_v16 = vsel %vm398_vm0, %v397_v15, 0.0 }
  0x96   : > { %v420_v12 = vpop.permute.xlu0 %419 }
  0x97   : > { %v424_v22 = vmul.f32 %v420_v12, %v404_v16 }
  0x9a   : > { %v395_v13 = vpop.permute.xlu0 %394 }
  0x9b   : > { %v1917_v14 = vsel %vm398_vm0, 0.0, %v395_v13  ;;  %v1929_v17 = vsel %vm398_vm0, %v395_v13, %v397_v15 }
  0x9c   : > { %447 = vrot.lane.b32.xlu0 %v1917_v14, %s2427_s18  ;;  %468 = vrot.lane.b32.xlu1 %v1917_v14, %s2425_s20  ;;  %v423_v18 = vmul.f32 %v420_v12, %v1929_v17  ;;  %v422_v19 = vmul.f32 %v420_v12, %v1917_v14  ;;  %v409_v60 = vsel %vm1988_vm2, %v1917_v14, 0.0  ;;  %v410_v15 = vsel %vm2001_vm6, %v1929_v17, 0.0 }
  0xa0   : > { %512 = vrot.lane.b32.xlu0 %v1917_v14, %s2423_s21  ;;  %533 = vrot.lane.b32.xlu1 %v1917_v14, %s2421_s25  ;;  %v556_v24 = vpop.permute.xlu0 %555 }
  0xa1   : > { %v559_v25 = vmul.f32 %v556_v24, %v1929_v17  ;;  %v560_v29 = vmul.f32 %v556_v24, %v404_v16  ;;  %v558_v30 = vmul.f32 %v556_v24, %v1917_v14 }
  0xa2   : > { %v491_v20 = vpop.permute.xlu1 %490 }
  0xa3   : > { %v494_v21 = vmul.f32 %v491_v20, %v1929_v17  ;;  %v493_v23 = vmul.f32 %v491_v20, %v1917_v14  ;;  %v495_v26 = vmul.f32 %v491_v20, %v404_v16 }
  0xa4   : > { %472 = vrot.lane.b32.xlu0 %v404_v16, %s2425_s20  ;;  %449 = vrot.lane.b32.xlu1 %v1929_v17, %s2427_s18 }
  0xa5   : > { %v1978_v35 = vpop.permute.xlu0 %482 }
  0xa7   : > { %v414_v32 = vpop.permute.xlu1 %413 }
  0xa8   : > { %537 = vrot.lane.b32.xlu0 %v404_v16, %s2421_s25  ;;  %451 = vrot.lane.b32.xlu1 %v404_v16, %s2427_s18  ;;  %v416_v63 = vmul.f32 %v414_v32, %v409_v60 }
  0xaa   : > { %v1980_v36 = vpop.permute.xlu0 %547 }
  0xac   : > { %579 = vrot.lane.b32.xlu0 %v1929_v17, %s2417_s26  ;;  %470 = vrot.lane.b32.xlu1 %v1929_v17, %s2425_s20  ;;  %v462_v33 = vpop.permute.xlu1 %461 }
  0xb0   : > { %514 = vrot.lane.b32.xlu1 %v1929_v17, %s2423_s21  ;;  %430 = vrot.lane.b32.xlu0 %v423_v18, %s2415_s27  ;;  %v417_v18 = vmul.f32 %v414_v32, %v410_v15 }
  0xb1   : > { %v1976_v34 = vpop.permute.xlu1 %526 }
  0xb4   : > { %516 = vrot.lane.b32.xlu1 %v404_v16, %s2423_s21  ;;  %428 = vrot.lane.b32.xlu0 %v422_v19, %s2415_s27 }
  0xb6   : > { %v1982_v37 = vpop.permute.xlu1 %591 }
  0xb8   : > { %535 = vrot.lane.b32.xlu1 %v1929_v17, %s2421_s25  ;;  %501 = vrot.lane.b32.xlu0 %v494_v21, %s2413_s28 }
  0xbc   : > { %432 = vrot.lane.b32.xlu1 %v424_v22, %s2415_s27  ;;  %499 = vrot.lane.b32.xlu0 %v493_v23, %s2413_s28 }
  0xc0   : > { %581 = vrot.lane.b32.xlu1 %v404_v16, %s2417_s26  ;;  %566 = vrot.lane.b32.xlu0 %v559_v25, %s2419_s29 }
  0xc4   : > { %503 = vrot.lane.b32.xlu1 %v495_v26, %s2413_s28  ;;  %577 = vrot.lane.b32.xlu0 %v1917_v14, %s2417_s26  ;;  %s2447_s28 = smov 126  }
  0xc8   : > { %568 = vrot.lane.b32.xlu1 %v560_v29, %s2419_s29  ;;  %601 = vperm.xlu0 %1643, %v598_v28  }
  0xcc   : > { %564 = vrot.lane.b32.xlu1 %v558_v30, %s2419_s29  ;;  %1646 = vset.pattern.permute.xlu0 %v1767_v4 }
  0xd0   : > { %712 = vperm.xlu1 %1644, %v1972_v31  }
  0xd4   : > { %1645 = vset.pattern.permute.xlu1 %v1766_v2 }
 0x10e   : > { %v448_v38 = vpop.permute.xlu0 %447  ;;  %v469_v39 = vpop.permute.xlu1 %468 }
 0x112   : > { %v513_v40 = vpop.permute.xlu0 %512  ;;  %v1984_v41 = vpop.permute.xlu1 %533 }
 0x116   : > { %v473_v42 = vpop.permute.xlu0 %472  ;;  %v450_v43 = vpop.permute.xlu1 %449 }
 0x117   : > { %v454_v59 = vsel %vm453_vm1, %v448_v38, %v450_v43 }
 0x118   : > { %v458_v12 = vsel %vm1992_vm4, %v454_v59, 0.0 }
 0x119   : > { %v464_v19 = vmul.f32 %v462_v33, %v458_v12 }
 0x11a   : > { %v538_v45 = vpop.permute.xlu0 %537  ;;  %v452_v46 = vpop.permute.xlu1 %451 }
 0x11b   : > { %v455_v1 = vsel %vm453_vm1, %v450_v43, %v452_v46 }
 0x11c   : > { %v459_v16 = vsel %vm2005_vm7, %v455_v1, 0.0 }
 0x11d   : > { %v465_v25 = vmul.f32 %v462_v33, %v459_v16 }
 0x11e   : > { %v1986_v48 = vpop.permute.xlu0 %579  ;;  %v471_v49 = vpop.permute.xlu1 %470 }
 0x11f   : > { %v475_v13 = vsel %vm474_vm5, %v469_v39, %v471_v49  ;;  %v476_v20 = vsel %vm474_vm5, %v471_v49, %v473_v42 }
 0x120   : > { %v479_v23 = vsel %vm1988_vm2, %v475_v13, 0.0  ;;  %v480_v17 = vsel %vm2001_vm6, %v476_v20, 0.0 }
 0x121   : > { %v485_v29 = vmul.f32 %v1978_v35, %v479_v23  ;;  %v486_v33 = vmul.f32 %v1978_v35, %v480_v17  ;;  %v390_v23 = vld [vmem:[%s2405_s3] sm:$0xff] }
 0x122   : > { %v431_v52 = vpop.permute.xlu0 %430  ;;  %v515_v53 = vpop.permute.xlu1 %514 }
 0x123   : > { %v519_v30 = vsel %vm518_vm8, %v513_v40, %v515_v53 }
 0x124   : > { %v523_v47 = vsel %vm1992_vm4, %v519_v30, 0.0 }
 0x125   : > { %v529_v54 = vmul.f32 %v1976_v34, %v523_v47 }
 0x126   : > { %v429_v56 = vpop.permute.xlu0 %428  ;;  %v517_v57 = vpop.permute.xlu1 %516 }
 0x127   : > { %v435_v61 = vsel %vm434_vm3, %v429_v56, %v431_v52  ;;  %v520_v32 = vsel %vm518_vm8, %v515_v53, %v517_v57 }
 0x128   : > { %v439_v14 = vadd.f32 %v435_v61, %v416_v63  ;;  %v524_v49 = vsel %vm2005_vm7, %v520_v32, 0.0 }
 0x129   : > { %v530_v56 = vmul.f32 %v1976_v34, %v524_v49 }
 0x12a   : > { %v502_v2 = vpop.permute.xlu0 %501  ;;  %v536_v4 = vpop.permute.xlu1 %535  ;;  %v466_v26 = vadd.f32 %v464_v19, %v439_v14 }
 0x12b   : > { %v541_v44 = vsel %vm539_vm10, %v536_v4, %v538_v45  ;;  %v540_v40 = vsel %vm539_vm10, %v1984_v41, %v536_v4 }
 0x12c   : > { %v487_v46 = vadd.f32 %v485_v29, %v466_v26  ;;  %v545_v53 = vsel %vm2001_vm6, %v541_v44, 0.0  ;;  %v544_v41 = vsel %vm1988_vm2, %v540_v40, 0.0 }
 0x12d   : > { %v551_v60 = vmul.f32 %v1980_v36, %v545_v53  ;;  %v550_v34 = vmul.f32 %v1980_v36, %v544_v41 }
 0x12e   : > { %v500_v21 = vpop.permute.xlu0 %499  ;;  %v433_v22 = vpop.permute.xlu1 %432 }
 0x12f   : > { %v436_v24 = vsel %vm434_vm3, %v431_v52, %v433_v22  ;;  %v506_v43 = vsel %vm505_vm9, %v500_v21, %v502_v2 }
 0x130   : > { %v440_v28 = vadd.f32 %v436_v24, %v417_v18  ;;  %v510_v50 = vadd.f32 %v506_v43, %v487_v46  ;;  %v879_v46 = vld [vmem:[%s2409_s7] sm:$0xff] }
 0x132   : > { %v467_v38 = vadd.f32 %v465_v25, %v440_v28  ;;  %v567_v39 = vpop.permute.xlu0 %566  ;;  %v582_v42 = vpop.permute.xlu1 %581  ;;  %v531_v61 = vadd.f32 %v529_v54, %v510_v50 }
 0x133   : > { %v585_v57 = vsel %vm583_vm11, %v1986_v48, %v582_v42 }
 0x134   : > { %v488_v51 = vadd.f32 %v486_v33, %v467_v38  ;;  %v589_v4 = vsel %vm2005_vm7, %v585_v57, 0.0  ;;  %v552_v16 = vadd.f32 %v550_v34, %v531_v61 }
 0x135   : > { %v595_v19 = vmul.f32 %v1982_v37, %v589_v4 }
 0x136   : > { %v504_v52 = vpop.permute.xlu1 %503  ;;  %v578_v35 = vpop.permute.xlu0 %577 }
 0x137   : > { %v507_v45 = vsel %vm505_vm9, %v502_v2, %v504_v52  ;;  %v584_v63 = vsel %vm583_vm11, %v578_v35, %v1986_v48 }
 0x138   : > { %v511_v59 = vadd.f32 %v507_v45, %v488_v51  ;;  %v588_v13 = vsel %vm1992_vm4, %v584_v63, 0.0 }
 0x139   : > { %v594_v20 = vmul.f32 %v1982_v37, %v588_v13 }
 0x13a   : > { %v532_v1 = vadd.f32 %v530_v56, %v511_v59  ;;  %v569_v2 = vpop.permute.xlu1 %568 }
 0x13b   : > { %v572_v14 = vsel %vm570_vm12, %v567_v39, %v569_v2 }
 0x13c   : > { %v553_v12 = vadd.f32 %v551_v60, %v532_v1 }
 0x13e   : > { %v576_v15 = vadd.f32 %v572_v14, %v553_v12  ;;  %v565_v18 = vpop.permute.xlu1 %564 }
 0x13f   : > { %v571_v48 = vsel %vm570_vm12, %v565_v18, %v567_v39 }
 0x140   : > { %v575_v21 = vadd.f32 %v571_v48, %v552_v16  ;;  %v597_v22 = vadd.f32 %v595_v19, %v576_v15 }
 0x142   : > { %1423 = vmatprep.subr.msk.mxu0 %vm608_vm13, %v597_v22  ;;  %v596_v36 = vadd.f32 %v594_v20, %v575_v21 }
 0x144   : > { %1424 = vmatpush1.msk.msra.mxu0 %vm608_vm13, %v596_v36 }
 0x145   : > { %1425 = vmatmul.mubr.msk.f32.vlgmr.msra.gmra.mrb[0].mxu0 %vm604_vm14, %v390_v23 }
 0x147   : > { %v602_v24 = vpop.permute.xlu0 %601 }
 0x218   : > { %v681_v25 = vpop.f32.mrb[0].mxu0 }
 0x219   : > { %v682_v26 = vadd.f32 %v681_v25, %v602_v24  ;;  %v683_v28 = vpop.f32.mrb[1].mxu0 }
 0x21a   : > { %v684_v17 = vadd.f32 %v683_v28, %v602_v24 }
 0x21b   : > { %v686_v37 = vmax.f32 %v682_v26, 0.0 }
 0x21c   : > { %v687_v29 = vmax.f32 %v684_v17, 0.0 }
 0x21d   : > { %692 = vrot.lane.b32.xlu1 %v686_v37, %s2429_s12 }
 0x21e   : > { %694 = vrot.lane.b32.xlu0 %v687_v29, %s2429_s12  ;;  %s1420_s12 = sshll.u32 %s350_s0, 3 }
 0x221   : > { %776 = vperm.xlu1 %1645, %v1972_v31  }
 0x222   : > { %838 = vperm.xlu0 %1646, %v1972_v31  }
 0x225   : > { %1647 = vset.pattern.permute.xlu1 %v1770_v7 }
 0x226   : > { %706 = vperm.xlu1 %1647, %v1972_v31   ;;  %1649 = vset.pattern.permute.xlu0 %v1769_v6  ;;  %v713_v6 = vpop.permute.xlu1 %712 }
 0x227   : > { %768 = vperm.xlu0 %1649, %v1972_v31  }
 0x22a   : > { %1648 = vset.pattern.permute.xlu1 %v1772_v9 }
 0x22b   : > { %748 = vperm.xlu1 %1648, %v1972_v31   ;;  %1651 = vset.pattern.permute.xlu0 %v1771_v8 }
 0x22c   : > { %830 = vperm.xlu0 %1651, %v1972_v31  }
 0x22f   : > { %1650 = vset.pattern.permute.xlu1 %v1773_v10 }
 0x230   : > { %810 = vperm.xlu1 %1650, %v1972_v31   ;;  %1653 = vset.pattern.permute.xlu0 %v1770_v7 }
 0x234   : > { %1652 = vset.pattern.permute.xlu1 %v1774_v11 }
 0x235   : > { %872 = vperm.xlu1 %1652, %v1972_v31  }
 0x239   : > { %1699 = vset.pattern.permute.xlu1 %v1770_v7 }
 0x28f   : > { %v693_v9 = vpop.permute.xlu1 %692 }
 0x290   : > { %v2082_v30 = vsel %vm398_vm0, 0.0, %v693_v9  ;;  %v695_v8 = vpop.permute.xlu0 %694 }
 0x291   : > { %755 = vrot.lane.b32.xlu1 %v2082_v30, %s2425_s20  ;;  %735 = vrot.lane.b32.xlu0 %v2082_v30, %s2427_s18  ;;  %v2093_v7 = vsel %vm398_vm0, %v693_v9, %v695_v8  ;;  %v701_v10 = vsel %vm398_vm0, %v695_v8, 0.0  ;;  %v715_v11 = vmul.f32 %v713_v6, %v2082_v30  ;;  %v702_v14 = vsel %vm1988_vm2, %v2082_v30, 0.0 }
 0x292   : > { %v716_v38 = vmul.f32 %v713_v6, %v2093_v7  ;;  %v717_v42 = vmul.f32 %v713_v6, %v701_v10  ;;  %v703_v23 = vsel %vm2001_vm6, %v2093_v7, 0.0 }
 0x295   : > { %817 = vrot.lane.b32.xlu1 %v2082_v30, %s2421_s25  ;;  %797 = vrot.lane.b32.xlu0 %v2082_v30, %s2423_s21 }
 0x299   : > { %759 = vrot.lane.b32.xlu0 %v701_v10, %s2425_s20  ;;  %737 = vrot.lane.b32.xlu1 %v2093_v7, %s2427_s18 }
 0x29d   : > { %821 = vrot.lane.b32.xlu0 %v701_v10, %s2421_s25  ;;  %739 = vrot.lane.b32.xlu1 %v701_v10, %s2427_s18  ;;  %s2452_s18 = smov 94  }
 0x2a0   : > { %v777_v31 = vpop.permute.xlu1 %776 }
 0x2a1   : > { %861 = vrot.lane.b32.xlu0 %v2093_v7, %s2417_s26  ;;  %757 = vrot.lane.b32.xlu1 %v2093_v7, %s2425_s20  ;;  %v779_v32 = vmul.f32 %v777_v31, %v2082_v30  ;;  %v780_v39 = vmul.f32 %v777_v31, %v2093_v7  ;;  %v839_v43 = vpop.permute.xlu0 %838  ;;  %v781_v44 = vmul.f32 %v777_v31, %v701_v10 }
 0x2a2   : > { %v842_v33 = vmul.f32 %v839_v43, %v2093_v7  ;;  %v843_v47 = vmul.f32 %v839_v43, %v701_v10  ;;  %v841_v49 = vmul.f32 %v839_v43, %v2082_v30 }
 0x2a5   : > { %721 = vrot.lane.b32.xlu0 %v715_v11, %s2444_s30  ;;  %799 = vrot.lane.b32.xlu1 %v2093_v7, %s2423_s21  ;;  %v707_v40 = vpop.permute.xlu1 %706 }
 0x2a6   : > { %v769_v52 = vpop.permute.xlu0 %768  ;;  %v709_v16 = vmul.f32 %v707_v40, %v702_v14  ;;  %v710_v26 = vmul.f32 %v707_v40, %v703_v23  ;;  %v1100_v23 = vld [vmem:[%s2403_s1 + $0x80] sm:$0xff] }
 0x2a9   : > { %801 = vrot.lane.b32.xlu1 %v701_v10, %s2423_s21  ;;  %785 = vrot.lane.b32.xlu0 %v779_v32, %s2445_s11  ;;  %s2449_s21 = smov 110  }
 0x2aa   : > { %v749_v50 = vpop.permute.xlu1 %748 }
 0x2ab   : > { %v2131_v53 = vpop.permute.xlu0 %830 }
 0x2ad   : > { %819 = vrot.lane.b32.xlu1 %v2093_v7, %s2421_s25  ;;  %723 = vrot.lane.b32.xlu0 %v716_v38, %s2444_s30  ;;  %s2450_s25 = smov 96  }
 0x2af   : > { %v811_v51 = vpop.permute.xlu1 %810 }
 0x2b1   : > { %725 = vrot.lane.b32.xlu1 %v717_v42, %s2444_s30  ;;  %787 = vrot.lane.b32.xlu0 %v780_v39, %s2445_s11 }
 0x2b4   : > { %v2133_v35 = vpop.permute.xlu1 %872 }
 0x2b5   : > { %863 = vrot.lane.b32.xlu1 %v701_v10, %s2417_s26  ;;  %849 = vrot.lane.b32.xlu0 %v842_v33, %s2419_s29 }
 0x2b9   : > { %789 = vrot.lane.b32.xlu1 %v781_v44, %s2445_s11  ;;  %859 = vrot.lane.b32.xlu0 %v2082_v30, %s2417_s26  ;;  %s2448_s26 = smov 112  }
 0x2bd   : > { %851 = vrot.lane.b32.xlu1 %v843_v47, %s2419_s29  ;;  %882 = vperm.xlu0 %1653, %v879_v46  }
 0x2c1   : > { %847 = vrot.lane.b32.xlu1 %v841_v49, %s2419_s29 }
 0x303   : > { %v736_v45 = vpop.permute.xlu0 %735  ;;  %v756_v54 = vpop.permute.xlu1 %755 }
 0x307   : > { %v798_v56 = vpop.permute.xlu0 %797  ;;  %v818_v57 = vpop.permute.xlu1 %817 }
 0x30b   : > { %v760_v59 = vpop.permute.xlu0 %759  ;;  %v738_v41 = vpop.permute.xlu1 %737 }
 0x30c   : > { %v741_v34 = vsel %vm453_vm1, %v736_v45, %v738_v41 }
 0x30d   : > { %v745_v15 = vsel %vm1992_vm4, %v741_v34, 0.0 }
 0x30e   : > { %v751_v22 = vmul.f32 %v749_v50, %v745_v15 }
 0x30f   : > { %v822_v60 = vpop.permute.xlu0 %821  ;;  %v740_v61 = vpop.permute.xlu1 %739 }
 0x310   : > { %v742_v18 = vsel %vm453_vm1, %v738_v41, %v740_v61 }
 0x311   : > { %v746_v24 = vsel %vm2005_vm7, %v742_v18, 0.0 }
 0x312   : > { %v752_v9 = vmul.f32 %v749_v50, %v746_v24  ;;  %v1101_v24 = vld [vmem:[%s2403_s1 + $0x88] sm:$0xff] }
 0x313   : > { %v862_v63 = vpop.permute.xlu0 %861  ;;  %v758_v1 = vpop.permute.xlu1 %757 }
 0x314   : > { %v761_v19 = vsel %vm474_vm5, %v756_v54, %v758_v1  ;;  %v762_v28 = vsel %vm474_vm5, %v758_v1, %v760_v59 }
 0x315   : > { %v765_v25 = vsel %vm1988_vm2, %v761_v19, 0.0  ;;  %v766_v7 = vsel %vm2001_vm6, %v762_v28, 0.0  ;;  %v1103_v28 = vld [vmem:[%s2403_s1 + $0x98] sm:$0xff] }
 0x316   : > { %v771_v30 = vmul.f32 %v769_v52, %v765_v25  ;;  %v772_v42 = vmul.f32 %v769_v52, %v766_v7  ;;  %v1511_v25 = vpack.c.bf16 %v1101_v24, %v1100_v23 }
 0x317   : > { %v722_v2 = vpop.permute.xlu0 %721  ;;  %v800_v4 = vpop.permute.xlu1 %799 }
 0x318   : > { %v803_v10 = vsel %vm518_vm8, %v798_v56, %v800_v4  ;;  %1512 = vmatprep.subr.bf16.mxu0 %v1511_v25 }
 0x319   : > { %v807_v33 = vsel %vm1992_vm4, %v803_v10, 0.0  ;;  %v1088_v10 = vld [vmem:[%s2403_s1 + $0x20] sm:$0xff] }
 0x31a   : > { %v813_v56 = vmul.f32 %v811_v51, %v807_v33  ;;  %v1108_v33 = vld [vmem:[%s2403_s1 + $0xc0] sm:$0xff] }
 0x31b   : > { %v786_v12 = vpop.permute.xlu0 %785  ;;  %v802_v13 = vpop.permute.xlu1 %801 }
 0x31c   : > { %v804_v11 = vsel %vm518_vm8, %v800_v4, %v802_v13 }
 0x31d   : > { %v808_v44 = vsel %vm2005_vm7, %v804_v11, 0.0  ;;  %v1089_v11 = vld [vmem:[%s2403_s1 + $0x28] sm:$0xff] }
 0x31e   : > { %v814_v59 = vmul.f32 %v811_v51, %v808_v44  ;;  %v1109_v44 = vld [vmem:[%s2403_s1 + $0xc8] sm:$0xff] }
 0x31f   : > { %v724_v48 = vpop.permute.xlu0 %723  ;;  %v820_v20 = vpop.permute.xlu1 %819 }
 0x320   : > { %v727_v21 = vsel %vm434_vm3, %v722_v2, %v724_v48  ;;  %v824_v43 = vsel %vm539_vm10, %v820_v20, %v822_v60  ;;  %v823_v47 = vsel %vm539_vm10, %v818_v57, %v820_v20 }
 0x321   : > { %v731_v36 = vadd.f32 %v727_v21, %v709_v16  ;;  %v828_v45 = vsel %vm2001_vm6, %v824_v43, 0.0  ;;  %v827_v61 = vsel %vm1988_vm2, %v823_v47, 0.0  ;;  %v1091_v43 = vld [vmem:[%s2403_s1 + $0x38] sm:$0xff]  ;;  %v1527_v47 = vpack.c.bf16 %v1109_v44, %v1108_v33 }
 0x322   : > { %v834_v1 = vmul.f32 %v2131_v53, %v828_v45  ;;  %v833_v13 = vmul.f32 %v2131_v53, %v827_v61  ;;  %v688_v53 = vld [vmem:[%s2408_s6] sm:$0xff]  ;;  %v1111_v45 = vld [vmem:[%s2403_s1 + $0xd8] sm:$0xff] }
 0x323   : > { %v753_v17 = vadd.f32 %v751_v22, %v731_v36  ;;  %v788_v37 = vpop.permute.xlu0 %787  ;;  %v726_v29 = vpop.permute.xlu1 %725 }
 0x324   : > { %v728_v6 = vsel %vm434_vm3, %v724_v48, %v726_v29  ;;  %v791_v46 = vsel %vm505_vm9, %v786_v12, %v788_v37  ;;  %v1086_v29 = vld [vmem:[%s2403_s1 + $0x10] sm:$0xff] }
 0x325   : > { %v732_v8 = vadd.f32 %v728_v6, %v710_v26  ;;  %v773_v31 = vadd.f32 %v771_v30, %v753_v17  ;;  %v1085_v26 = vld [vmem:[%s2403_s1 + $0x8] sm:$0xff]  ;;  %v1087_v6 = vld [vmem:[%s2403_s1 + $0x18] sm:$0xff] }
 0x326   : > { %v1105_v30 = vld [vmem:[%s2403_s1 + $0xa8] sm:$0xff] }
 0x327   : > { %v754_v32 = vadd.f32 %v752_v9, %v732_v8  ;;  %v850_v38 = vpop.permute.xlu0 %849  ;;  %v864_v39 = vpop.permute.xlu1 %863  ;;  %v795_v49 = vadd.f32 %v791_v46, %v773_v31  ;;  %v1104_v9 = vld [vmem:[%s2403_s1 + $0xa0] sm:$0xff]  ;;  %v1517_v8 = vpack.c.bf16 %v1087_v6, %v1086_v29  ;;  %v1106_v31 = vld [vmem:[%s2403_s1 + $0xb0] sm:$0xff] }
 0x328   : > { %v866_v41 = vsel %vm583_vm11, %v862_v63, %v864_v39  ;;  %v1519_v7 = vpack.c.bf16 %v1105_v30, %v1104_v9 }
 0x329   : > { %v774_v40 = vadd.f32 %v772_v42, %v754_v32  ;;  %v815_v57 = vadd.f32 %v813_v56, %v795_v49  ;;  %v870_v12 = vsel %vm2005_vm7, %v866_v41, 0.0  ;;  %v1107_v32 = vld [vmem:[%s2403_s1 + $0xb8] sm:$0xff]  ;;  %v1090_v42 = vld [vmem:[%s2403_s1 + $0x30] sm:$0xff]  ;;  %v1092_v49 = vld [vmem:[%s2403_s1 + $0x40] sm:$0xff] }
 0x32a   : > { %v876_v48 = vmul.f32 %v2133_v35, %v870_v12  ;;  %v1523_v39 = vpack.c.bf16 %v1107_v32, %v1106_v31  ;;  %v1525_v46 = vpack.c.bf16 %v1091_v43, %v1090_v42  ;;  %v1094_v56 = vld [vmem:[%s2403_s1 + $0x50] sm:$0xff]  ;;  %v1112_v41 = vld [vmem:[%s2403_s1 + $0xe0] sm:$0xff] }
 0x32b   : > { %v790_v50 = vpop.permute.xlu1 %789  ;;  %v860_v54 = vpop.permute.xlu0 %859  ;;  %v835_v16 = vadd.f32 %v833_v13, %v815_v57  ;;  %v1096_v57 = vld [vmem:[%s2403_s1 + $0x60] sm:$0xff] }
 0x32c   : > { %v792_v52 = vsel %vm505_vm9, %v788_v37, %v790_v50  ;;  %v865_v2 = vsel %vm583_vm11, %v860_v54, %v862_v63  ;;  %v1110_v50 = vld [vmem:[%s2403_s1 + $0xd0] sm:$0xff] }
 0x32d   : > { %v796_v60 = vadd.f32 %v792_v52, %v774_v40  ;;  %v869_v51 = vsel %vm1992_vm4, %v865_v2, 0.0  ;;  %v1093_v40 = vld [vmem:[%s2403_s1 + $0x48] sm:$0xff]  ;;  %v1531_v52 = vpack.c.bf16 %v1111_v45, %v1110_v50 }
 0x32e   : > { %v875_v22 = vmul.f32 %v2133_v35, %v869_v51  ;;  %v1084_v35 = vld [vmem:[%s2403_s1] sm:$0xff]  ;;  %v1529_v54 = vpack.c.bf16 %v1093_v40, %v1092_v49  ;;  %v1097_v2 = vld [vmem:[%s2403_s1 + $0x68] sm:$0xff]  ;;  %v1099_v51 = vld [vmem:[%s2403_s1 + $0x78] sm:$0xff] }
 0x32f   : > { %v816_v4 = vadd.f32 %v814_v59, %v796_v60  ;;  %v852_v34 = vpop.permute.xlu1 %851  ;;  %v1513_v17 = vpack.c.bf16 %v1085_v26, %v1084_v35  ;;  %v1095_v59 = vld [vmem:[%s2403_s1 + $0x58] sm:$0xff]  ;;  %v1113_v60 = vld [vmem:[%s2403_s1 + $0xe8] sm:$0xff]  ;;  %v1537_v12 = vpack.c.bf16 %v1097_v2, %v1096_v57 }
 0x330   : > { %v854_v15 = vsel %vm570_vm12, %v850_v38, %v852_v34  ;;  %v1533_v61 = vpack.c.bf16 %v1095_v59, %v1094_v56  ;;  %v1115_v34 = vld [vmem:[%s2403_s1 + $0xf8] sm:$0xff] }
 0x331   : > { %v836_v14 = vadd.f32 %v834_v1, %v816_v4  ;;  %1514 = vmatpush3.bf16.msra.mxu0 %v1513_v17  ;;  %v1535_v1 = vpack.c.bf16 %v1113_v60, %v1112_v41  ;;  %v1114_v4 = vld [vmem:[%s2403_s1 + $0xf0] sm:$0xff] }
 0x332   : > { %v1539_v13 = vpack.c.bf16 %v1115_v34, %v1114_v4 }
 0x333   : > { %v848_v18 = vpop.permute.xlu1 %847  ;;  %v858_v19 = vadd.f32 %v854_v15, %v836_v14  ;;  %v1098_v14 = vld [vmem:[%s2403_s1 + $0x70] sm:$0xff] }
 0x334   : > { %v853_v63 = vsel %vm570_vm12, %v848_v18, %v850_v38  ;;  %v1521_v38 = vpack.c.bf16 %v1089_v11, %v1088_v10  ;;  %v1541_v15 = vpack.c.bf16 %v1099_v51, %v1098_v14 }
 0x335   : > { %v857_v20 = vadd.f32 %v853_v63, %v835_v16  ;;  %v878_v21 = vadd.f32 %v876_v48, %v858_v19 }
 0x337   : > { %889 = vmatprep.subr.mxu1 %v878_v21  ;;  %v877_v36 = vadd.f32 %v875_v22, %v857_v20 }
 0x339   : > { %890 = vmatpush1.msra.mxu1 %v877_v36 }
 0x33a   : > { %1426 = vmatmul.mubr.msk.f32.vlgmr.msra.gmra.mrb[0].mxu1 %vm885_vm15, %v688_v53  ;;  %1544 = vmatprep.subr.bf16.mxu1 %v1511_v25 }
 0x33b   : > { %1251 = vmatprep.mubr.f32.mxu1 %v1905_v5  ;;  %v1102_v5 = vld [vmem:[%s2403_s1 + $0x90] sm:$0xff]  ;;  %1546 = vmatpush3.bf16.msra.mxu1 %v1513_v17  ;;  %v1258_v17 = vld [vmem:[%s2411_s9] sm:$0xff] }
 0x33c   : > { %v1515_v37 = vpack.c.bf16 %v1103_v28, %v1102_v5  ;;  %v883_v16 = vpop.permute.xlu0 %882 }
 0x33e   : > { %1548 = vmatprep.subr.bf16.mxu1 %v1515_v37  ;;  %1516 = vmatprep.subr.bf16.mxu0 %v1515_v37 }
 0x33f   : > { %1550 = vmatpush3.bf16.msra.mxu1 %v1517_v8  ;;  %1518 = vmatpush3.bf16.msra.mxu0 %v1517_v8 }
 0x340   : > { %1552 = vmatprep.subr.bf16.mxu1 %v1519_v7  ;;  %1520 = vmatprep.subr.bf16.mxu0 %v1519_v7 }
 0x343   : > { %1554 = vmatpush3.bf16.msra.mxu1 %v1521_v38  ;;  %1522 = vmatpush3.bf16.msra.mxu0 %v1521_v38 }
 0x344   : > { %1556 = vmatprep.subr.bf16.mxu1 %v1523_v39  ;;  %1524 = vmatprep.subr.bf16.mxu0 %v1523_v39 }
 0x347   : > { %1558 = vmatpush3.bf16.msra.mxu1 %v1525_v46  ;;  %1526 = vmatpush3.bf16.msra.mxu0 %v1525_v46 }
 0x348   : > { %1560 = vmatprep.subr.bf16.mxu1 %v1527_v47  ;;  %1528 = vmatprep.subr.bf16.mxu0 %v1527_v47 }
 0x34b   : > { %1562 = vmatpush3.bf16.msra.mxu1 %v1529_v54  ;;  %1530 = vmatpush3.bf16.msra.mxu0 %v1529_v54 }
 0x34c   : > { %1564 = vmatprep.subr.bf16.mxu1 %v1531_v52  ;;  %1532 = vmatprep.subr.bf16.mxu0 %v1531_v52 }
 0x34f   : > { %1566 = vmatpush3.bf16.msra.mxu1 %v1533_v61  ;;  %1534 = vmatpush3.bf16.msra.mxu0 %v1533_v61 }
 0x350   : > { %1568 = vmatprep.subr.bf16.mxu1 %v1535_v1  ;;  %1536 = vmatprep.subr.bf16.mxu0 %v1535_v1 }
 0x353   : > { %1570 = vmatpush3.bf16.msra.mxu1 %v1537_v12  ;;  %1538 = vmatpush3.bf16.msra.mxu0 %v1537_v12 }
 0x354   : > { %1572 = vmatprep.subr.bf16.mxu1 %v1539_v13  ;;  %1540 = vmatprep.subr.bf16.mxu0 %v1539_v13 }
 0x357   : > { %1574 = vmatpush3.bf16.msra.mxu1 %v1541_v15  ;;  %1542 = vmatpush3.bf16.msra.mxu0 %v1541_v15 }
 0x358   : > { %1506 = vmatprep.subr.mxu0 %v1783_v27 }
 0x35a   : > { %1252 = vmatmul.mubr.f32.vlgmr.msra.gmra.mrb[2].mxu1 %v1898_v3 }
 0x40d   : > { %v955_v18 = vpop.f32.mrb[0].mxu1 }
 0x40e   : > { %v956_v19 = vadd.f32 %v955_v18, %v883_v16  ;;  %v957_v48 = vpop.f32.mrb[1].mxu1 }
 0x40f   : > { %v958_v63 = vadd.f32 %v957_v48, %v883_v16 }
 0x410   : > { %v960_v20 = vmax.f32 %v956_v19, 0.0 }
 0x411   : > { %v961_v21 = vmax.f32 %v958_v63, 0.0 }
 0x413   : > { %v1654_v22 = vpack.i.bf16 %v961_v21, %v960_v20 }
 0x415   : > { %1655 = vrot.lane.b32.xlu1 %v1654_v22, %s2446_s2  ;;  %s1430_s2 = sshll.u32 %s1862_s17, 7  ;;  %s1785_s17 = smov [#allocation2]  }
 0x416   : > { %s1705_s20 = sshll.u32 %s1785_s17, 4  ;;  %s1706_s20 = int_to_ptr.vmem [resolvable:$false] %s1705_s20 }
 0x417   : > { %s1707_s29 = scalar_lea.vmem %s1706_s20, 256 }
 0x42d   : > { %v1501_v26 = vpop.f32.mrb[2].mxu1 }
 0x42e   : > { %v1502_v5 = vpop.f32.mrb[3].mxu1 }
 0x42f   : > { %v2299_v28 = vadd.f32 %v1502_v5, %v1501_v26 }
 0x487   : > { %v1656_v36 = vpop.permute.xlu1 %1655 }
 0x488   : > { %v1658_v53 = vunpack.i.h.bf16 %v1656_v36  ;;  %v1657_v23 = vunpack.i.l.bf16 %v1656_v36 }
 0x48a   : > { %v973_v24 = vsel %vm398_vm0, %v1658_v53, 0.0  ;;  %v968_v35 = vsel %vm398_vm0, %v1657_v23, %v1658_v53  ;;  %v972_v25 = vsel %vm398_vm0, 0.0, %v1657_v23  ;;  %vm1784_vm0 = vmmov 0  }
 0x48b   : > { %978 = vrot.lane.b32.xlu0 %v972_v25, %s2444_s30  ;;  %v1659_v3 = vpack.i.bf16 %v973_v24, %v968_v35  ;;  %v974_v40 = vsel %vm1988_vm2, %v972_v25, 0.0  ;;  %v975_v50 = vsel %vm2001_vm6, %v968_v35, 0.0 }
 0x48d   : > { %1660 = vrot.lane.b32.xlu1 %v1659_v3, %s2444_s30  ;;  %s2451_s30 = smov 95  }
 0x48f   : > { %990 = vrot.lane.b32.xlu0 %v972_v25, %s2447_s28 }
 0x491   : > { %1665 = vrot.lane.b32.xlu1 %v1659_v3, %s2447_s28  ;;  %s352_s28 = scalar_lea.vmem [#allocation2], %s1420_s12 }
 0x493   : > { %1004 = vrot.lane.b32.xlu0 %v972_v25, %s2448_s26 }
 0x495   : > { %1670 = vrot.lane.b32.xlu1 %v1659_v3, %s2448_s26  ;;  %s1357_s26 = sshll.u32 %s352_s28, 4  ;;  %s2362_s26 = int_to_ptr.vmem [resolvable:$true] %s1357_s26 }
 0x496   : > { %p1708_p0 = scmp.lt.s32.totalorder %s2362_s26, %s1706_s20 }
 0x497   : > { %1018 = vrot.lane.b32.xlu0 %v972_v25, %s2445_s11 }
 0x499   : > { %1675 = vrot.lane.b32.xlu1 %v1659_v3, %s2445_s11  ;;  %s1701_s11 = scalar_lea.vmem %s2362_s26, 128 }
 0x49a   : > { %p1702_p11 = scmp.ne.s32.totalorder %s2362_s26, %s1701_s11  ;;  %p1709_p1 = scmp.lt.s32.totalorder %s1707_s29, %s1701_s11 }
 0x49b   : > { %1030 = vrot.lane.b32.xlu0 %v972_v25, %s2449_s21 }
 0x49c   : > { %p1703_p12 = pnand %p1702_p11, %p1879_p5  ;;  %p1710_p2 = por %p1709_p1, %p1708_p0 }
 0x49d   : > { %1680 = vrot.lane.b32.xlu1 %v1659_v3, %s2449_s21 }
 0x49e   : > { %p1704_p13 = pneg %p1703_p12 }
 0x49f   : > { %1044 = vrot.lane.b32.xlu0 %v972_v25, %s2450_s25 }
 0x4a0   : > { %p1711_p3 = pnand %p1710_p2, %p1704_p13 }
 0x4a1   : > { %1685 = vrot.lane.b32.xlu1 %v1659_v3, %s2450_s25 }
 0x4a3   : > { %1058 = vrot.lane.b32.xlu0 %v972_v25, %s2451_s30 }
 0x4a5   : > { %1690 = vrot.lane.b32.xlu1 %v1659_v3, %s2451_s30  ;;  %s2360_s30 = scalar_lea.hbm %s2412_s10, %s1430_s2 }
 0x4a7   : > { %1070 = vrot.lane.b32.xlu0 %v972_v25, %s2452_s18 }
 0x4a9   : > { %1695 = vrot.lane.b32.xlu1 %v1659_v3, %s2452_s18  ;;  %s1344_s18 = scalar_lea.sflag [#allocation3], %s350_s0 }
 0x4ad   : > { %1261 = vperm.xlu1 %1699, %v1258_v17  }
 0x4fd   : > { %v979_v37 = vpop.permute.xlu0 %978 }
 0x4ff   : > { %v1661_v29 = vpop.permute.xlu1 %1660 }
 0x500   : > { %v1663_v10 = vunpack.i.h.bf16 %v1661_v29  ;;  %v1662_v11 = vunpack.i.l.bf16 %v1661_v29 }
 0x501   : > { %v991_v6 = vpop.permute.xlu0 %990 }
 0x502   : > { %v984_v33 = vsel %vm434_vm3, %v979_v37, %v1662_v11  ;;  %v985_v44 = vsel %vm434_vm3, %v1662_v11, %v1663_v10 }
 0x503   : > { %v1666_v9 = vpop.permute.xlu1 %1665  ;;  %v988_v56 = vmax.f32 %v974_v40, %v984_v33  ;;  %v989_v59 = vmax.f32 %v975_v50, %v985_v44  ;;  %v1257_v44 = vld [vmem:[%s2410_s8] sm:$0xff] }
 0x504   : > { %v1668_v8 = vunpack.i.h.bf16 %v1666_v9  ;;  %v1667_v7 = vunpack.i.l.bf16 %v1666_v9 }
 0x505   : > { %v1005_v30 = vpop.permute.xlu0 %1004 }
 0x506   : > { %v996_v42 = vsel %vm453_vm1, %v991_v6, %v1667_v7  ;;  %v997_v43 = vsel %vm453_vm1, %v1667_v7, %v1668_v8  ;;  %vm1341_vm1 = vcmask 523264  }
 0x507   : > { %v1671_v31 = vpop.permute.xlu1 %1670  ;;  %v1000_v45 = vsel %vm1992_vm4, %v996_v42, 0.0  ;;  %v1001_v54 = vsel %vm2005_vm7, %v997_v43, 0.0 }
 0x508   : > { %v1673_v32 = vunpack.i.h.bf16 %v1671_v31  ;;  %v1672_v38 = vunpack.i.l.bf16 %v1671_v31  ;;  %v1002_v2 = vmax.f32 %v988_v56, %v1000_v45  ;;  %v1003_v4 = vmax.f32 %v989_v59, %v1001_v54 }
 0x509   : > { %v1019_v39 = vpop.permute.xlu0 %1018 }
 0x50a   : > { %v1010_v47 = vsel %vm474_vm5, %v1005_v30, %v1672_v38  ;;  %v1011_v49 = vsel %vm474_vm5, %v1672_v38, %v1673_v32 }
 0x50b   : > { %v1676_v46 = vpop.permute.xlu1 %1675  ;;  %v1014_v41 = vsel %vm1988_vm2, %v1010_v47, 0.0  ;;  %v1015_v60 = vsel %vm2001_vm6, %v1011_v49, 0.0 }
 0x50c   : > { %v1678_v61 = vunpack.i.h.bf16 %v1676_v46  ;;  %v1677_v1 = vunpack.i.l.bf16 %v1676_v46  ;;  %v1016_v14 = vmax.f32 %v1002_v2, %v1014_v41  ;;  %v1017_v51 = vmax.f32 %v1003_v4, %v1015_v60 }
 0x50d   : > { %v1031_v52 = vpop.permute.xlu0 %1030 }
 0x50e   : > { %v1024_v18 = vsel %vm505_vm9, %v1019_v39, %v1677_v1  ;;  %v1025_v19 = vsel %vm505_vm9, %v1677_v1, %v1678_v61 }
 0x50f   : > { %v1681_v57 = vpop.permute.xlu1 %1680  ;;  %v1028_v36 = vmax.f32 %v1016_v14, %v1024_v18  ;;  %v1029_v53 = vmax.f32 %v1017_v51, %v1025_v19 }
 0x510   : > { %v1683_v34 = vunpack.i.h.bf16 %v1681_v57  ;;  %v1682_v12 = vunpack.i.l.bf16 %v1681_v57 }
 0x511   : > { %v1045_v13 = vpop.permute.xlu0 %1044 }
 0x512   : > { %v1036_v15 = vsel %vm518_vm8, %v1031_v52, %v1682_v12  ;;  %v1037_v16 = vsel %vm518_vm8, %v1682_v12, %v1683_v34 }
 0x513   : > { %v1686_v48 = vpop.permute.xlu1 %1685  ;;  %v1040_v21 = vsel %vm1992_vm4, %v1036_v15, 0.0  ;;  %v1041_v22 = vsel %vm2005_vm7, %v1037_v16, 0.0 }
 0x514   : > { %v1688_v63 = vunpack.i.h.bf16 %v1686_v48  ;;  %v1687_v20 = vunpack.i.l.bf16 %v1686_v48  ;;  %v1042_v5 = vmax.f32 %v1028_v36, %v1040_v21  ;;  %v1043_v17 = vmax.f32 %v1029_v53, %v1041_v22 }
 0x515   : > { %v1059_v3 = vpop.permute.xlu0 %1058 }
 0x516   : > { %v1050_v23 = vsel %vm539_vm10, %v1045_v13, %v1687_v20  ;;  %v1051_v24 = vsel %vm539_vm10, %v1687_v20, %v1688_v63 }
 0x517   : > { %v1054_v35 = vsel %vm1988_vm2, %v1050_v23, 0.0  ;;  %v1055_v25 = vsel %vm2001_vm6, %v1051_v24, 0.0  ;;  %v1691_v26 = vpop.permute.xlu1 %1690 }
 0x518   : > { %v1693_v37 = vunpack.i.h.bf16 %v1691_v26  ;;  %v1692_v29 = vunpack.i.l.bf16 %v1691_v26  ;;  %v1056_v6 = vmax.f32 %v1042_v5, %v1054_v35  ;;  %v1057_v9 = vmax.f32 %v1043_v17, %v1055_v25 }
 0x519   : > { %v1071_v55 = vpop.permute.xlu0 %1070 }
 0x51a   : > { %v1064_v30 = vsel %vm570_vm12, %v1059_v3, %v1692_v29  ;;  %v1065_v8 = vsel %vm570_vm12, %v1692_v29, %v1693_v37 }
 0x51b   : > { %v1696_v7 = vpop.permute.xlu1 %1695  ;;  %v1068_v31 = vmax.f32 %v1056_v6, %v1064_v30  ;;  %v1069_v32 = vmax.f32 %v1057_v9, %v1065_v8 }
 0x51c   : > { %v1698_v10 = vunpack.i.h.bf16 %v1696_v7  ;;  %v1697_v11 = vunpack.i.l.bf16 %v1696_v7 }
 0x51e   : > { %v1076_v62 = vsel %vm583_vm11, %v1071_v55, %v1697_v11  ;;  %v1077_v38 = vsel %vm583_vm11, %v1697_v11, %v1698_v10 }
 0x51f   : > { %v1080_v39 = vsel %vm1992_vm4, %v1076_v62, 0.0  ;;  %v1081_v42 = vsel %vm2005_vm7, %v1077_v38, 0.0 }
 0x520   : > { %v1083_v43 = vmax.f32 %v1069_v32, %v1081_v42  ;;  %v1082_v33 = vmax.f32 %v1068_v31, %v1080_v39 }
 0x522   : > { %1180 = vmatprep.mubr.f32.mxu0 %v1083_v43 }
 0x523   : > { %1181 = vmatmul.mubr.f32.vlgmr.msra.gmra.mrb[2].mxu0 %v1082_v33 }
 0x524   : > { %1507 = vmatpush3.msk.msra.mxu0 %vm608_vm13, %v2299_v28  ;;  %1508 = vmatprep.mubr.msk.f32.mxu0 %vm1784_vm0, %v1783_v27 }
 0x527   : > { %1509 = vmatmul.mubr.msk.f32.vlgmr.msra.gmra.mrb[4].mxu0 %vm604_vm14, %v1257_v44 }
 0x52c   : > { %v1262_v47 = vpop.permute.xlu1 %1261 }
 0x5f6   : > { %v1466_v58 = vpop.f32.mrb[2].mxu0 }
 0x5f7   : > { %v1467_v0 = vpop.f32.mrb[3].mxu0 }
 0x5f8   : > { %v1468_v46 = vadd.f32 %v1467_v0, %v1466_v58 }
 0x5fa   : > { %v1336_v49 = vpop.f32.mrb[4].mxu0 }
 0x5fb   : > { %v1337_v28 = vadd.f32 %v1336_v49, %v1262_v47  ;;  %v1510_v40 = vpop.f32.mrb[5].mxu0 }
 0x5fd   : > { %v1340_v27 = vadd.f32 %v1468_v46, %v1337_v28 }
 0x5ff   : > { %1342 = vst.msk [vmem:[%s352_s28] sm:$0xff] %vm1341_vm1, %v1340_v27 }
 0x600   : > { %1714 = shalt.err (!%p1711_p3)
}
 0x601   : > { %s1715_s27 = scalar_lea.hbm %s2360_s30, 128  ;;  %s1719_s2 = scalar_lea.hbm %s2412_s10, 256 }
 0x602   : > { %p1716_p4 = scmp.ne.s32.totalorder %s2360_s30, %s1715_s27  ;;  %p1720_p9 = scmp.lt.u32.totalorder %s2360_s30, %s2412_s10 }
 0x603   : > { %p1721_p10 = scmp.lt.u32.totalorder %s1719_s2, %s1715_s27  ;;  %p1723_p12 = scmp.lt.u32.totalorder %s1715_s27, %s2360_s30 }
 0x604   : > { %p1717_p7 = pnand %p1716_p4, %p1879_p5 }
 0x605   : > { %p1722_p11 = por %p1721_p10, %p1720_p9 }
 0x606   : > { %p1718_p8 = pneg %p1717_p7 }
 0x607   : > { %p1724_p13 = por %p1723_p12, %p1722_p11 }
 0x609   : > { %p1725_p0 = pnand %p1724_p13, %p1718_p8 }
 0x60b   : > { %1728 = shalt.err (!%p1725_p0)
}
 0x60c   : > { %1575 = dma.vmem_to_hbm [thread:$0]  (%p1879_p5), %s2362_s26, 128, %s2360_s30, %s1344_s18  }
 0x60d PF: > { %p1581_p1 = scmp.ge.s32.totalorder %s1763_s16, 2  ;;  %s1369_s25 = sand.u32 1, %s1751_s13  }
 0x60e   : > { %s1370_s11 = scalar_lea.sflag [#allocation3], %s1369_s25 }
 0x60f   : > { %p1578_p2 = pnand %p1581_p1, %p1883_p6 }
 0x611   : > { %1746 = dma.done.wait (!%p1578_p2), %s1370_s11, 128  }
 0x612   : > { %1748 = vsyncadd (!%p1578_p2), %s1370_s11, 4294967168  ;;  %p20_p3 = scmp.ge.s32.totalorder %s1866_s19, 4   ;;  %s2453_s13 = smov %s1755_s14 }
 0x613   : > { %s2454_s14 = smov %s1759_s15  ;;  %s2455_s15 = smov %s1877_s22 }
 0x614   : > { %s2456_s16 = smov %s1866_s19  ;;  %22 = sbr.rel (!%p20_p3) target bundleno = 6 (0x6), region = 95 }
 0x61b   :  { %1375 = vsyncpa [#allocation3], 1 }
 0x61c   :  { %1377 = vsyncpa [#allocation3 + $0x1], 1 }

</bundles_post_ra>
